<compile_context>
chip_gen: v5e
topology: v5e:2x2
jax: 0.10.0
libtpu: 0.0.40
codegen_flags: <defaults>
</compile_context>

<pallas_src>
import jax
import jax.numpy as jnp
from jax.experimental import pallas as pl
from jax.experimental.pallas import tpu as pltpu

_LANE = 128


def _round_up(x, m):
    return ((x + m - 1) // m) * m


# --------------------------------------------------------------------------- #
# Kernel body
# --------------------------------------------------------------------------- #
def _mlp_kernel(
    x_ref,
    w1_ref, t1_ref,
    w2_ref, t2_ref,
    w3_ref, t3_ref,
    w4_ref, b4_ref,
    out_ref,
):
    # x arrives f32 from HBM; cast to bf16 on the VPU (free co-issued op) so the
    # MXU runs bf16 operands with f32 accumulation. Epilogue stays f32 (safe on
    # v5e, which has no bf16 VPU).
    xb = x_ref[...].astype(jnp.bfloat16)

    h = jnp.dot(xb, w1_ref[...], preferred_element_type=jnp.float32)
    h = jnp.maximum(h + t1_ref[...], 0.0).astype(jnp.bfloat16)

    h = jnp.dot(h, w2_ref[...], preferred_element_type=jnp.float32)
    h = jnp.maximum(h + t2_ref[...], 0.0).astype(jnp.bfloat16)
    # Dropout(p=0.5) is the identity in eval mode.

    h = jnp.dot(h, w3_ref[...], preferred_element_type=jnp.float32)
    h = jnp.maximum(h + t3_ref[...], 0.0).astype(jnp.bfloat16)

    logits = jnp.dot(h, w4_ref[...], preferred_element_type=jnp.float32) + b4_ref[...]
    out_ref[...] = logits.astype(out_ref.dtype)


# --------------------------------------------------------------------------- #
# One-time parameter preparation (hoisted out of the forward call)
# --------------------------------------------------------------------------- #
def _fold_bn_into_linear(w, b, gamma, beta, mean, var, eps=1e-5):
    """Fold eval-mode BN + linear bias into (W', shift), all in float32."""
    scale = gamma / jnp.sqrt(var + eps)                 # (out,)
    w_folded = w * scale[None, :]                       # per-output-column scale
    shift = (b - mean) * scale + beta                   # (out,)
    return w_folded, shift.reshape(1, -1)


def prepare_params(params, eps=1e-5):
    """One-time preprocessing: BN fold (f32), class-dim lane padding, bf16 cast.

    Call once per parameter set and cache the result; deeper_mlp_forward then
    does zero weight-side work per call.
    """
    w1f, t1 = _fold_bn_into_linear(params["w1"], params["b1"],
                                   params["bn1_g"], params["bn1_b"],
                                   params["bn1_m"], params["bn1_v"], eps)
    w2f, t2 = _fold_bn_into_linear(params["w2"], params["b2"],
                                   params["bn2_g"], params["bn2_b"],
                                   params["bn2_m"], params["bn2_v"], eps)
    w3f, t3 = _fold_bn_into_linear(params["w3"], params["b3"],
                                   params["bn3_g"], params["bn3_b"],
                                   params["bn3_m"], params["bn3_v"], eps)
    w4f = params["w4"]
    b4 = params["b4"].reshape(1, -1)

    num_classes = w4f.shape[1]
    c_pad = _round_up(num_classes, _LANE)
    if c_pad != num_classes:
        # Lane-dense output: pad classes to a multiple of 128 (zero columns are
        # sliced off in the wrapper). Removes masked partial stores.
        w4f = jnp.pad(w4f, ((0, 0), (0, c_pad - num_classes)))
        b4 = jnp.pad(b4, ((0, 0), (0, c_pad - num_classes)))

    # bf16 cast AFTER f32 BN folding (avoids double rounding). Shifts stay f32.
    return dict(
        w1=w1f.astype(jnp.bfloat16), t1=t1,
        w2=w2f.astype(jnp.bfloat16), t2=t2,
        w3=w3f.astype(jnp.bfloat16), t3=t3,
        w4=w4f.astype(jnp.bfloat16), b4=b4,
        num_classes=num_classes,
    )


# --------------------------------------------------------------------------- #
# Batch-tile heuristic
# --------------------------------------------------------------------------- #
def _choose_batch_tile(B, *, target_tile=512, min_steps=4):
    """Pick a batch tile.

    Goals: >= min_steps grid steps when the batch allows (2 steps per
    TensorCore on 2-TC v7x -> pipelined x/out DMAs per core), tiles are
    multiples of 8 (snapped up to multiples of 128 for MXU M-occupancy when
    that keeps padding waste <= ~12.5%), and tile growth toward `target_tile`
    rows for large batches to amortize per-grid-step overhead (v6e/v5e).
    """
    B8 = _round_up(max(int(B), 1), 8)
    n_steps = max(min_steps, -(-B8 // target_tile))
    tile = _round_up(-(-B8 // n_steps), 8)
    tile128 = _round_up(tile, 128)
    if tile128 <= B8 and tile128 * (-(-B8 // tile128)) <= (B8 * 9) // 8:
        tile = tile128
    return max(tile, 8)


# --------------------------------------------------------------------------- #
# pallas_call builder + forward
# --------------------------------------------------------------------------- #
def _build_forward(B_pad, batch_tile, input_dim, hidden, c_pad, n_steps,
                   vmem_limit, *, single_buffer_weights):
    def weight_spec(shape):
        # Grid-invariant operands: index_map is constant across the batch grid,
        # so they are never re-fetched; single-buffering halves their VMEM.
        if single_buffer_weights:
            return pl.BlockSpec(shape, lambda i: (0, 0), pipeline_mode=pl.Buffered(1))
        return pl.BlockSpec(shape, lambda i: (0, 0))

    in_specs = [
        pl.BlockSpec((batch_tile, input_dim), lambda i: (i, 0)),   # x tile (f32)
        weight_spec((input_dim, hidden)), weight_spec((1, hidden)),   # layer 1
        weight_spec((hidden, hidden)), weight_spec((1, hidden)),      # layer 2
        weight_spec((hidden, hidden)), weight_spec((1, hidden)),      # layer 3
        weight_spec((hidden, c_pad)), weight_spec((1, c_pad)),        # layer 4
    ]
    out_specs = pl.BlockSpec((batch_tile, c_pad), lambda i: (i, 0))

    return pl.pallas_call(
        _mlp_kernel,
        out_shape=jax.ShapeDtypeStruct((B_pad, c_pad), jnp.float32),
        grid_spec=pltpu.PrefetchScalarGridSpec(
            num_scalar_prefetch=0,
            grid=(n_steps,),
            in_specs=in_specs,
            out_specs=out_specs,
        ),
        compiler_params=pltpu.CompilerParams(
            dimension_semantics=("parallel",),
            vmem_limit_bytes=vmem_limit,
        ),
    )


def deeper_mlp_forward(x, prepared, *, batch_tile=None):
    """Fused MLP forward. x: (B, input_dim) f32; `prepared` from prepare_params().

    Returns (B, num_classes) f32 logits.
    """
    B, input_dim = x.shape
    hidden = prepared["w1"].shape[1]
    c_pad = prepared["w4"].shape[1]
    num_classes = prepared["num_classes"]
    if prepared["w1"].shape[0] != input_dim:
        raise ValueError(
            f"input_dim mismatch: x has {input_dim}, params expect {prepared['w1'].shape[0]}")

    # ---- batch tiling (only per-call reshaping of x: an optional batch pad) ----
    if batch_tile is None:
        batch_tile = _choose_batch_tile(B)
    batch_tile = max(8, _round_up(int(batch_tile), 8))
    B_pad = _round_up(B, batch_tile)
    if B_pad != B:
        x = jnp.pad(x, ((0, B_pad - B), (0, 0)))
    n_steps = B_pad // batch_tile

    # ---- generation-aware VMEM budget ----
    weight_bytes_1x = (2 * (input_dim * hidden + 2 * hidden * hidden + hidden * c_pad)
                       + 4 * (3 * hidden + c_pad))                 # bf16 weights + f32 shifts
    io_bytes = 2 * 4 * batch_tile * (input_dim + c_pad)            # double-buffered x/out tiles
    act_bytes = 6 * 4 * batch_tile * hidden                        # f32 acc + bf16 copies (slack)
    try:
        phys_vmem = pltpu.get_tpu_info().vmem_capacity_bytes
    except Exception:
        phys_vmem = 64 << 20                                       # conservative: v7x per-TC VMEM
    vmem_cap = int(phys_vmem * 0.85)                               # headroom for compiler scratch
    if weight_bytes_1x + io_bytes + act_bytes > vmem_cap:
        # TODO(synk): hidden-dim streaming split with accumulator (see header TODO).
        raise NotImplementedError(
            "hidden_dim too large for the weights-resident kernel on this chip "
            f"(~{(weight_bytes_1x + io_bytes + act_bytes) >> 20} MiB needed, "
            f"VMEM cap ~{vmem_cap >> 20} MiB)")
    need = 2 * weight_bytes_1x + io_bytes + act_bytes              # worst case (fallback path)
    vmem_limit = int(min(max(int(1.25 * need), 32 << 20), vmem_cap))

    args = (x,
            prepared["w1"], prepared["t1"],
            prepared["w2"], prepared["t2"],
            prepared["w3"], prepared["t3"],
            prepared["w4"], prepared["b4"])

    try:
        fn = _build_forward(B_pad, batch_tile, input_dim, hidden, c_pad, n_steps,
                            vmem_limit, single_buffer_weights=True)
        out = fn(*args)
    except Exception:
        # Fallback if this jax version rejects pl.Buffered(1) for the outer
        # pallas_call pipeline: use default (double-buffered) weight specs.
        fn = _build_forward(B_pad, batch_tile, input_dim, hidden, c_pad, n_steps,
                            vmem_limit, single_buffer_weights=False)
        out = fn(*args)

    return out[:B, :num_classes]


# --------------------------------------------------------------------------- #
# Parameter init + plain-JAX references
# --------------------------------------------------------------------------- #
def init_params(key, input_dim, num_classes, hidden_dim):
    """Deterministic synthetic parameters (shapes match the PyTorch module)."""
    keys = jax.random.split(key, 8)

    def linear(k, fan_in, fan_out):
        # (in, out) layout = transpose of PyTorch's (out, in)
        w = jax.random.normal(k, (fan_in, fan_out), jnp.float32) * (1.0 / jnp.sqrt(fan_in))
        b = jnp.zeros((fan_out,), jnp.float32)
        return w, b

    w1, b1 = linear(keys[0], input_dim, hidden_dim)
    w2, b2 = linear(keys[1], hidden_dim, hidden_dim)
    w3, b3 = linear(keys[2], hidden_dim, hidden_dim)
    w4, b4 = linear(keys[3], hidden_dim, num_classes)

    def bn(k, dim):
        gamma = 1.0 + 0.1 * jax.random.normal(k, (dim,), jnp.float32)
        beta = jnp.zeros((dim,), jnp.float32)
        mean = jnp.zeros((dim,), jnp.float32)     # PyTorch default running_mean
        var = jnp.ones((dim,), jnp.float32)       # PyTorch default running_var
        return gamma, beta, mean, var

    bn1_g, bn1_b, bn1_m, bn1_v = bn(keys[4], hidden_dim)
    bn2_g, bn2_b, bn2_m, bn2_v = bn(keys[5], hidden_dim)
    bn3_g, bn3_b, bn3_m, bn3_v = bn(keys[6], hidden_dim)

    return dict(
        w1=w1, b1=b1, w2=w2, b2=b2, w3=w3, b3=b3, w4=w4, b4=b4,
        bn1_g=bn1_g, bn1_b=bn1_b, bn1_m=bn1_m, bn1_v=bn1_v,
        bn2_g=bn2_g, bn2_b=bn2_b, bn2_m=bn2_m, bn2_v=bn2_v,
        bn3_g=bn3_g, bn3_b=bn3_b, bn3_m=bn3_m, bn3_v=bn3_v,
    )


def reference_forward_f32(x, params):
    """Plain-JAX full-precision reference of the same eval-mode forward."""
    def bn(h, g, b, m, v, eps=1e-5):
        return (h - m) / jnp.sqrt(v + eps) * g + b

    h = x @ params["w1"] + params["b1"]
    h = jax.nn.relu(bn(h, params["bn1_g"], params["bn1_b"], params["bn1_m"], params["bn1_v"]))
    h = h @ params["w2"] + params["b2"]
    h = jax.nn.relu(bn(h, params["bn2_g"], params["bn2_b"], params["bn2_m"], params["bn2_v"]))
    h = h @ params["w3"] + params["b3"]
    h = jax.nn.relu(bn(h, params["bn3_g"], params["bn3_b"], params["bn3_m"], params["bn3_v"]))
    return h @ params["w4"] + params["b4"]


def reference_forward_bf16(x, params):
    """Plain-JAX reference using the same bf16-weights / f32-accumulate scheme as the kernel."""
    w1, t1 = _fold_bn_into_linear(params["w1"], params["b1"],
                                  params["bn1_g"], params["bn1_b"],
                                  params["bn1_m"], params["bn1_v"])
    w2, t2 = _fold_bn_into_linear(params["w2"], params["b2"],
                                  params["bn2_g"], params["bn2_b"],
                                  params["bn2_m"], params["bn2_v"])
    w3, t3 = _fold_bn_into_linear(params["w3"], params["b3"],
                                  params["bn3_g"], params["bn3_b"],
                                  params["bn3_m"], params["bn3_v"])
    bf = jnp.bfloat16
    h = jnp.dot(x.astype(bf), w1.astype(bf), preferred_element_type=jnp.float32) + t1
    h = jnp.maximum(h, 0.0)
    h = jnp.dot(h.astype(bf), w2.astype(bf), preferred_element_type=jnp.float32) + t2
    h = jnp.maximum(h, 0.0)
    h = jnp.dot(h.astype(bf), w3.astype(bf), preferred_element_type=jnp.float32) + t3
    h = jnp.maximum(h, 0.0)
    return (jnp.dot(h.astype(bf), params["w4"].astype(bf), preferred_element_type=jnp.float32)
            + params["b4"])


if __name__ == "__main__":
    # Small MLP shapes; batch large enough to exercise >= 4 pipelined grid steps.
    B, INPUT_DIM, HIDDEN, NUM_CLASSES = 512, 64, 128, 10

    key = jax.random.PRNGKey(0)
    kx, kp = jax.random.split(key)
    x = jax.random.normal(kx, (B, INPUT_DIM), jnp.float32)
    params = init_params(kp, INPUT_DIM, NUM_CLASSES, HIDDEN)

    prepared = prepare_params(params)          # one-time; callers should cache this
    out = deeper_mlp_forward(x, prepared)      # tile=128 -> grid=(4,), 2 steps/TC on v7x
    out = jax.block_until_ready(out)
    assert out.shape == (B, NUM_CLASSES)

    # Exact-scheme check (same bf16 cast + f32 accumulation as the kernel).
    ref_bf16 = reference_forward_bf16(x, params)
    assert jnp.allclose(out, ref_bf16, atol=2e-2, rtol=2e-2), "mismatch vs. bf16 reference"

    # Sanity check vs. the full-f32 module semantics (bf16 rounding tolerance).
    ref_f32 = reference_forward_f32(x, params)
    assert jnp.allclose(out, ref_f32, atol=1.5e-1, rtol=1.5e-1), "mismatch vs. f32 reference"

    print("KERNEL_OK")
</pallas_src>

<mosaic_0001>
module attributes {stable_mosaic.version = 11 : i64} {
  func.func @_mlp_kernel(%arg0: i32, %arg1: memref<128x64xf32, #tpu.memory_space<vmem>>, %arg2: memref<64x128xbf16, #tpu.memory_space<vmem>>, %arg3: memref<1x128xf32, #tpu.memory_space<vmem>>, %arg4: memref<128x128xbf16, #tpu.memory_space<vmem>>, %arg5: memref<1x128xf32, #tpu.memory_space<vmem>>, %arg6: memref<128x128xbf16, #tpu.memory_space<vmem>>, %arg7: memref<1x128xf32, #tpu.memory_space<vmem>>, %arg8: memref<128x128xbf16, #tpu.memory_space<vmem>>, %arg9: memref<1x128xf32, #tpu.memory_space<vmem>>, %arg10: memref<128x128xf32, #tpu.memory_space<vmem>>) attributes {dimension_semantics = [#tpu.dimension_semantics<parallel>], iteration_bounds = array<i64: 4>, scalar_prefetch = 0 : i64, scratch_operands = 0 : i64, tpu.core_type = #tpu.core_type<tc>, window_params = [{transform_indices = @transform_0, window_bounds = array<i64: 128, 64>}, {pipeline_mode = #tpu.pipeline_mode<synchronous>, transform_indices = @transform_1, window_bounds = array<i64: 64, 128>}, {pipeline_mode = #tpu.pipeline_mode<synchronous>, transform_indices = @transform_2, window_bounds = array<i64: 1, 128>}, {pipeline_mode = #tpu.pipeline_mode<synchronous>, transform_indices = @transform_3, window_bounds = array<i64: 128, 128>}, {pipeline_mode = #tpu.pipeline_mode<synchronous>, transform_indices = @transform_4, window_bounds = array<i64: 1, 128>}, {pipeline_mode = #tpu.pipeline_mode<synchronous>, transform_indices = @transform_5, window_bounds = array<i64: 128, 128>}, {pipeline_mode = #tpu.pipeline_mode<synchronous>, transform_indices = @transform_6, window_bounds = array<i64: 1, 128>}, {pipeline_mode = #tpu.pipeline_mode<synchronous>, transform_indices = @transform_7, window_bounds = array<i64: 128, 128>}, {pipeline_mode = #tpu.pipeline_mode<synchronous>, transform_indices = @transform_8, window_bounds = array<i64: 1, 128>}, {transform_indices = @transform_9, window_bounds = array<i64: 128, 128>}]} {
    %c0 = arith.constant 0 : index
    %c0_0 = arith.constant 0 : index
    %0 = vector.load %arg1[%c0, %c0_0] : memref<128x64xf32, #tpu.memory_space<vmem>>, vector<128x64xf32>
    %1 = arith.truncf %0 : vector<128x64xf32> to vector<128x64xbf16>
    %c0_1 = arith.constant 0 : index
    %c0_2 = arith.constant 0 : index
    %2 = vector.load %arg2[%c0_1, %c0_2] : memref<64x128xbf16, #tpu.memory_space<vmem>>, vector<64x128xbf16>
    %cst = arith.constant dense<0.000000e+00> : vector<128x128xf32>
    %3 = tpu.matmul %1, %2, %cst {dimension_numbers = #tpu.dot_dimension_numbers<[1], [0], [0], [1], [0, 0, 1, 1], [], []>} : vector<128x64xbf16>, vector<64x128xbf16>, vector<128x128xf32> -> vector<128x128xf32>
    %c0_3 = arith.constant 0 : index
    %c0_4 = arith.constant 0 : index
    %4 = vector.load %arg3[%c0_3, %c0_4] : memref<1x128xf32, #tpu.memory_space<vmem>>, vector<1x128xf32>
    %5 = vector.broadcast %4 : vector<1x128xf32> to vector<128x128xf32>
    %6 = arith.addf %3, %5 : vector<128x128xf32>
    %cst_5 = arith.constant 0.000000e+00 : f32
    %7 = vector.broadcast %cst_5 : f32 to vector<128x128xf32>
    %8 = arith.maximumf %6, %7 : vector<128x128xf32>
    %9 = arith.truncf %8 : vector<128x128xf32> to vector<128x128xbf16>
    %c0_6 = arith.constant 0 : index
    %c0_7 = arith.constant 0 : index
    %10 = vector.load %arg4[%c0_6, %c0_7] : memref<128x128xbf16, #tpu.memory_space<vmem>>, vector<128x128xbf16>
    %cst_8 = arith.constant dense<0.000000e+00> : vector<128x128xf32>
    %11 = tpu.matmul %9, %10, %cst_8 {dimension_numbers = #tpu.dot_dimension_numbers<[1], [0], [0], [1], [0, 0, 1, 1], [], []>} : vector<128x128xbf16>, vector<128x128xbf16>, vector<128x128xf32> -> vector<128x128xf32>
    %c0_9 = arith.constant 0 : index
    %c0_10 = arith.constant 0 : index
    %12 = vector.load %arg5[%c0_9, %c0_10] : memref<1x128xf32, #tpu.memory_space<vmem>>, vector<1x128xf32>
    %13 = vector.broadcast %12 : vector<1x128xf32> to vector<128x128xf32>
    %14 = arith.addf %11, %13 : vector<128x128xf32>
    %cst_11 = arith.constant 0.000000e+00 : f32
    %15 = vector.broadcast %cst_11 : f32 to vector<128x128xf32>
    %16 = arith.maximumf %14, %15 : vector<128x128xf32>
    %17 = arith.truncf %16 : vector<128x128xf32> to vector<128x128xbf16>
    %c0_12 = arith.constant 0 : index
    %c0_13 = arith.constant 0 : index
    %18 = vector.load %arg6[%c0_12, %c0_13] : memref<128x128xbf16, #tpu.memory_space<vmem>>, vector<128x128xbf16>
    %cst_14 = arith.constant dense<0.000000e+00> : vector<128x128xf32>
    %19 = tpu.matmul %17, %18, %cst_14 {dimension_numbers = #tpu.dot_dimension_numbers<[1], [0], [0], [1], [0, 0, 1, 1], [], []>} : vector<128x128xbf16>, vector<128x128xbf16>, vector<128x128xf32> -> vector<128x128xf32>
    %c0_15 = arith.constant 0 : index
    %c0_16 = arith.constant 0 : index
    %20 = vector.load %arg7[%c0_15, %c0_16] : memref<1x128xf32, #tpu.memory_space<vmem>>, vector<1x128xf32>
    %21 = vector.broadcast %20 : vector<1x128xf32> to vector<128x128xf32>
    %22 = arith.addf %19, %21 : vector<128x128xf32>
    %cst_17 = arith.constant 0.000000e+00 : f32
    %23 = vector.broadcast %cst_17 : f32 to vector<128x128xf32>
    %24 = arith.maximumf %22, %23 : vector<128x128xf32>
    %25 = arith.truncf %24 : vector<128x128xf32> to vector<128x128xbf16>
    %c0_18 = arith.constant 0 : index
    %c0_19 = arith.constant 0 : index
    %26 = vector.load %arg8[%c0_18, %c0_19] : memref<128x128xbf16, #tpu.memory_space<vmem>>, vector<128x128xbf16>
    %cst_20 = arith.constant dense<0.000000e+00> : vector<128x128xf32>
    %27 = tpu.matmul %25, %26, %cst_20 {dimension_numbers = #tpu.dot_dimension_numbers<[1], [0], [0], [1], [0, 0, 1, 1], [], []>} : vector<128x128xbf16>, vector<128x128xbf16>, vector<128x128xf32> -> vector<128x128xf32>
    %c0_21 = arith.constant 0 : index
    %c0_22 = arith.constant 0 : index
    %28 = vector.load %arg9[%c0_21, %c0_22] : memref<1x128xf32, #tpu.memory_space<vmem>>, vector<1x128xf32>
    %29 = vector.broadcast %28 : vector<1x128xf32> to vector<128x128xf32>
    %30 = arith.addf %27, %29 : vector<128x128xf32>
    %c0_23 = arith.constant 0 : index
    %c0_24 = arith.constant 0 : index
    %31 = vector.load %arg10[%c0_23, %c0_24] : memref<128x128xf32, #tpu.memory_space<vmem>>, vector<128x128xf32>
    tpu.vector_store %arg10[%c0_23, %c0_24], %30 {strides = array<i32>} : memref<128x128xf32, #tpu.memory_space<vmem>>, vector<128x128xf32>,
    return
  }
  func.func @transform_0(%arg0: i32) -> (i32, i32) {
    %c0_i32 = arith.constant 0 : i32
    %c0_i32_0 = arith.constant 0 : i32
    return %arg0, %c0_i32 : i32, i32
  }
  func.func @transform_1(%arg0: i32) -> (i32, i32) {
    %c0_i32 = arith.constant 0 : i32
    %c0_i32_0 = arith.constant 0 : i32
    %c0_i32_1 = arith.constant 0 : i32
    return %c0_i32, %c0_i32_0 : i32, i32
  }
  func.func @transform_2(%arg0: i32) -> (i32, i32) {
    %c0_i32 = arith.constant 0 : i32
    %c0_i32_0 = arith.constant 0 : i32
    %c0_i32_1 = arith.constant 0 : i32
    return %c0_i32, %c0_i32_0 : i32, i32
  }
  func.func @transform_3(%arg0: i32) -> (i32, i32) {
    %c0_i32 = arith.constant 0 : i32
    %c0_i32_0 = arith.constant 0 : i32
    %c0_i32_1 = arith.constant 0 : i32
    return %c0_i32, %c0_i32_0 : i32, i32
  }
  func.func @transform_4(%arg0: i32) -> (i32, i32) {
    %c0_i32 = arith.constant 0 : i32
    %c0_i32_0 = arith.constant 0 : i32
    %c0_i32_1 = arith.constant 0 : i32
    return %c0_i32, %c0_i32_0 : i32, i32
  }
  func.func @transform_5(%arg0: i32) -> (i32, i32) {
    %c0_i32 = arith.constant 0 : i32
    %c0_i32_0 = arith.constant 0 : i32
    %c0_i32_1 = arith.constant 0 : i32
    return %c0_i32, %c0_i32_0 : i32, i32
  }
  func.func @transform_6(%arg0: i32) -> (i32, i32) {
    %c0_i32 = arith.constant 0 : i32
    %c0_i32_0 = arith.constant 0 : i32
    %c0_i32_1 = arith.constant 0 : i32
    return %c0_i32, %c0_i32_0 : i32, i32
  }
  func.func @transform_7(%arg0: i32) -> (i32, i32) {
    %c0_i32 = arith.constant 0 : i32
    %c0_i32_0 = arith.constant 0 : i32
    %c0_i32_1 = arith.constant 0 : i32
    return %c0_i32, %c0_i32_0 : i32, i32
  }
  func.func @transform_8(%arg0: i32) -> (i32, i32) {
    %c0_i32 = arith.constant 0 : i32
    %c0_i32_0 = arith.constant 0 : i32
    %c0_i32_1 = arith.constant 0 : i32
    return %c0_i32, %c0_i32_0 : i32, i32
  }
  func.func @transform_9(%arg0: i32) -> (i32, i32) {
    %c0_i32 = arith.constant 0 : i32
    %c0_i32_0 = arith.constant 0 : i32
    return %arg0, %c0_i32 : i32, i32
  }
}

module attributes {stable_mosaic.version = 11 : i64} {
  func.func @_mlp_kernel(%arg0: i32, %arg1: memref<128x64xf32, #tpu.memory_space<vmem>>, %arg2: memref<64x128xbf16, #tpu.memory_space<vmem>>, %arg3: memref<1x128xf32, #tpu.memory_space<vmem>>, %arg4: memref<128x128xbf16, #tpu.memory_space<vmem>>, %arg5: memref<1x128xf32, #tpu.memory_space<vmem>>, %arg6: memref<128x128xbf16, #tpu.memory_space<vmem>>, %arg7: memref<1x128xf32, #tpu.memory_space<vmem>>, %arg8: memref<128x128xbf16, #tpu.memory_space<vmem>>, %arg9: memref<1x128xf32, #tpu.memory_space<vmem>>, %arg10: memref<128x128xf32, #tpu.memory_space<vmem>>) attributes {dimension_semantics = [#tpu.dimension_semantics<parallel>], iteration_bounds = array<i64: 4>, scalar_prefetch = 0 : i64, scratch_operands = 0 : i64, tpu.core_type = #tpu.core_type<tc>, window_params = [{transform_indices = @transform_0, window_bounds = array<i64: 128, 64>}, {pipeline_mode = #tpu.pipeline_mode<synchronous>, transform_indices = @transform_1, window_bounds = array<i64: 64, 128>}, {pipeline_mode = #tpu.pipeline_mode<synchronous>, transform_indices = @transform_2, window_bounds = array<i64: 1, 128>}, {pipeline_mode = #tpu.pipeline_mode<synchronous>, transform_indices = @transform_3, window_bounds = array<i64: 128, 128>}, {pipeline_mode = #tpu.pipeline_mode<synchronous>, transform_indices = @transform_4, window_bounds = array<i64: 1, 128>}, {pipeline_mode = #tpu.pipeline_mode<synchronous>, transform_indices = @transform_5, window_bounds = array<i64: 128, 128>}, {pipeline_mode = #tpu.pipeline_mode<synchronous>, transform_indices = @transform_6, window_bounds = array<i64: 1, 128>}, {pipeline_mode = #tpu.pipeline_mode<synchronous>, transform_indices = @transform_7, window_bounds = array<i64: 128, 128>}, {pipeline_mode = #tpu.pipeline_mode<synchronous>, transform_indices = @transform_8, window_bounds = array<i64: 1, 128>}, {transform_indices = @transform_9, window_bounds = array<i64: 128, 128>}]} {
    %c0 = arith.constant 0 : index
    %c0_0 = arith.constant 0 : index
    %0 = vector.load %arg1[%c0, %c0_0] : memref<128x64xf32, #tpu.memory_space<vmem>>, vector<128x64xf32>
    %1 = arith.truncf %0 : vector<128x64xf32> to vector<128x64xbf16>
    %c0_1 = arith.constant 0 : index
    %c0_2 = arith.constant 0 : index
    %2 = vector.load %arg2[%c0_1, %c0_2] : memref<64x128xbf16, #tpu.memory_space<vmem>>, vector<64x128xbf16>
    %cst = arith.constant dense<0.000000e+00> : vector<128x128xf32>
    %3 = tpu.matmul %1, %2, %cst {dimension_numbers = #tpu.dot_dimension_numbers<[1], [0], [0], [1], [0, 0, 1, 1], [], []>} : vector<128x64xbf16>, vector<64x128xbf16>, vector<128x128xf32> -> vector<128x128xf32>
    %c0_3 = arith.constant 0 : index
    %c0_4 = arith.constant 0 : index
    %4 = vector.load %arg3[%c0_3, %c0_4] : memref<1x128xf32, #tpu.memory_space<vmem>>, vector<1x128xf32>
    %5 = vector.broadcast %4 : vector<1x128xf32> to vector<128x128xf32>
    %6 = arith.addf %3, %5 : vector<128x128xf32>
    %cst_5 = arith.constant 0.000000e+00 : f32
    %7 = vector.broadcast %cst_5 : f32 to vector<128x128xf32>
    %8 = arith.maximumf %6, %7 : vector<128x128xf32>
    %9 = arith.truncf %8 : vector<128x128xf32> to vector<128x128xbf16>
    %c0_6 = arith.constant 0 : index
    %c0_7 = arith.constant 0 : index
    %10 = vector.load %arg4[%c0_6, %c0_7] : memref<128x128xbf16, #tpu.memory_space<vmem>>, vector<128x128xbf16>
    %cst_8 = arith.constant dense<0.000000e+00> : vector<128x128xf32>
    %11 = tpu.matmul %9, %10, %cst_8 {dimension_numbers = #tpu.dot_dimension_numbers<[1], [0], [0], [1], [0, 0, 1, 1], [], []>} : vector<128x128xbf16>, vector<128x128xbf16>, vector<128x128xf32> -> vector<128x128xf32>
    %c0_9 = arith.constant 0 : index
    %c0_10 = arith.constant 0 : index
    %12 = vector.load %arg5[%c0_9, %c0_10] : memref<1x128xf32, #tpu.memory_space<vmem>>, vector<1x128xf32>
    %13 = vector.broadcast %12 : vector<1x128xf32> to vector<128x128xf32>
    %14 = arith.addf %11, %13 : vector<128x128xf32>
    %cst_11 = arith.constant 0.000000e+00 : f32
    %15 = vector.broadcast %cst_11 : f32 to vector<128x128xf32>
    %16 = arith.maximumf %14, %15 : vector<128x128xf32>
    %17 = arith.truncf %16 : vector<128x128xf32> to vector<128x128xbf16>
    %c0_12 = arith.constant 0 : index
    %c0_13 = arith.constant 0 : index
    %18 = vector.load %arg6[%c0_12, %c0_13] : memref<128x128xbf16, #tpu.memory_space<vmem>>, vector<128x128xbf16>
    %cst_14 = arith.constant dense<0.000000e+00> : vector<128x128xf32>
    %19 = tpu.matmul %17, %18, %cst_14 {dimension_numbers = #tpu.dot_dimension_numbers<[1], [0], [0], [1], [0, 0, 1, 1], [], []>} : vector<128x128xbf16>, vector<128x128xbf16>, vector<128x128xf32> -> vector<128x128xf32>
    %c0_15 = arith.constant 0 : index
    %c0_16 = arith.constant 0 : index
    %20 = vector.load %arg7[%c0_15, %c0_16] : memref<1x128xf32, #tpu.memory_space<vmem>>, vector<1x128xf32>
    %21 = vector.broadcast %20 : vector<1x128xf32> to vector<128x128xf32>
    %22 = arith.addf %19, %21 : vector<128x128xf32>
    %cst_17 = arith.constant 0.000000e+00 : f32
    %23 = vector.broadcast %cst_17 : f32 to vector<128x128xf32>
    %24 = arith.maximumf %22, %23 : vector<128x128xf32>
    %25 = arith.truncf %24 : vector<128x128xf32> to vector<128x128xbf16>
    %c0_18 = arith.constant 0 : index
    %c0_19 = arith.constant 0 : index
    %26 = vector.load %arg8[%c0_18, %c0_19] : memref<128x128xbf16, #tpu.memory_space<vmem>>, vector<128x128xbf16>
    %cst_20 = arith.constant dense<0.000000e+00> : vector<128x128xf32>
    %27 = tpu.matmul %25, %26, %cst_20 {dimension_numbers = #tpu.dot_dimension_numbers<[1], [0], [0], [1], [0, 0, 1, 1], [], []>} : vector<128x128xbf16>, vector<128x128xbf16>, vector<128x128xf32> -> vector<128x128xf32>
    %c0_21 = arith.constant 0 : index
    %c0_22 = arith.constant 0 : index
    %28 = vector.load %arg9[%c0_21, %c0_22] : memref<1x128xf32, #tpu.memory_space<vmem>>, vector<1x128xf32>
    %29 = vector.broadcast %28 : vector<1x128xf32> to vector<128x128xf32>
    %30 = arith.addf %27, %29 : vector<128x128xf32>
    %c0_23 = arith.constant 0 : index
    %c0_24 = arith.constant 0 : index
    %31 = vector.load %arg10[%c0_23, %c0_24] : memref<128x128xf32, #tpu.memory_space<vmem>>, vector<128x128xf32>
    tpu.vector_store %arg10[%c0_23, %c0_24], %30 {strides = array<i32>} : memref<128x128xf32, #tpu.memory_space<vmem>>, vector<128x128xf32>,
    return
  }
  func.func @transform_0(%arg0: i32) -> (i32, i32) {
    %c0_i32 = arith.constant 0 : i32
    %c0_i32_0 = arith.constant 0 : i32
    return %arg0, %c0_i32 : i32, i32
  }
  func.func @transform_1(%arg0: i32) -> (i32, i32) {
    %c0_i32 = arith.constant 0 : i32
    %c0_i32_0 = arith.constant 0 : i32
    %c0_i32_1 = arith.constant 0 : i32
    return %c0_i32, %c0_i32_0 : i32, i32
  }
  func.func @transform_2(%arg0: i32) -> (i32, i32) {
    %c0_i32 = arith.constant 0 : i32
    %c0_i32_0 = arith.constant 0 : i32
    %c0_i32_1 = arith.constant 0 : i32
    return %c0_i32, %c0_i32_0 : i32, i32
  }
  func.func @transform_3(%arg0: i32) -> (i32, i32) {
    %c0_i32 = arith.constant 0 : i32
    %c0_i32_0 = arith.constant 0 : i32
    %c0_i32_1 = arith.constant 0 : i32
    return %c0_i32, %c0_i32_0 : i32, i32
  }
  func.func @transform_4(%arg0: i32) -> (i32, i32) {
    %c0_i32 = arith.constant 0 : i32
    %c0_i32_0 = arith.constant 0 : i32
    %c0_i32_1 = arith.constant 0 : i32
    return %c0_i32, %c0_i32_0 : i32, i32
  }
  func.func @transform_5(%arg0: i32) -> (i32, i32) {
    %c0_i32 = arith.constant 0 : i32
    %c0_i32_0 = arith.constant 0 : i32
    %c0_i32_1 = arith.constant 0 : i32
    return %c0_i32, %c0_i32_0 : i32, i32
  }
  func.func @transform_6(%arg0: i32) -> (i32, i32) {
    %c0_i32 = arith.constant 0 : i32
    %c0_i32_0 = arith.constant 0 : i32
    %c0_i32_1 = arith.constant 0 : i32
    return %c0_i32, %c0_i32_0 : i32, i32
  }
  func.func @transform_7(%arg0: i32) -> (i32, i32) {
    %c0_i32 = arith.constant 0 : i32
    %c0_i32_0 = arith.constant 0 : i32
    %c0_i32_1 = arith.constant 0 : i32
    return %c0_i32, %c0_i32_0 : i32, i32
  }
  func.func @transform_8(%arg0: i32) -> (i32, i32) {
    %c0_i32 = arith.constant 0 : i32
    %c0_i32_0 = arith.constant 0 : i32
    %c0_i32_1 = arith.constant 0 : i32
    return %c0_i32, %c0_i32_0 : i32, i32
  }
  func.func @transform_9(%arg0: i32) -> (i32, i32) {
    %c0_i32 = arith.constant 0 : i32
    %c0_i32_0 = arith.constant 0 : i32
    return %arg0, %c0_i32 : i32, i32
  }
}

</mosaic_0001>

<bundles_post_ra>
// kernel: tpu_custom_call.1
= control target key start
LH: loop header
LB: loop body
LE: loop exit
PB: predicated region body
PF: predicated region fallthrough
CT: control target
= control target key end

     0   :  { %14 = vsyncpa [#allocation3], 0  ;;  %s1573_s0 = inlined_call_operand.vmem [shape: f32[512,64], index: 0, kind: input, shape index: {}]   ;;  %s1574_s1 = inlined_call_operand.vmem [shape: bf16[64,128], index: 1, kind: input, shape index: {}]   ;;  %s1575_s2 = inlined_call_operand.vmem [shape: f32[1,128], index: 2, kind: input, shape index: {}]   ;;  %s1576_s3 = inlined_call_operand.vmem [shape: bf16[128,128], index: 3, kind: input, shape index: {}]   ;;  %s1577_s4 = inlined_call_operand.vmem [shape: f32[1,128], index: 4, kind: input, shape index: {}]   ;;  %s1578_s5 = inlined_call_operand.vmem [shape: bf16[128,128], index: 5, kind: input, shape index: {}]   ;;  %s1579_s6 = inlined_call_operand.vmem [shape: f32[1,128], index: 6, kind: input, shape index: {}]   ;;  %s1580_s7 = inlined_call_operand.vmem [shape: bf16[128,128], index: 7, kind: input, shape index: {}]   ;;  %s1581_s8 = inlined_call_operand.vmem [shape: f32[1,128], index: 8, kind: input, shape index: {}]   ;;  %s1582_s9 = inlined_call_operand.hbm [shape: f32[512,128], index: 9, kind: output, shape index: {}]  }
   0x1   :  { %16 = vsyncpa [#allocation3 + $0x1], 0  ;;  %s1308_s30 = smov 0   ;;  %s1310_s10 = smov 0  }
   0x2   :  { %s1312_s11 = smov 0   ;;  %s1314_s12 = smov 0  }
   0x3 LB: > { %s1329_s13 = sadd.s32 4294967295, %s1254_s12   ;;  %s986_s14 = sadd.s32 4294967294, %s1254_s12   ;;  %s1254_s12 = sphi %s1314_s12, %s1588_s12   ;;  %s1250_s11 = sphi %s1312_s11, %s1587_s11   ;;  %s1246_s10 = sphi %s1310_s10, %s1586_s10   ;;  %s1242_s30 = sphi %s1308_s30, %s1585_s30  }
   0x4   : > { %s1333_s15 = sadd.s32 1, %s1254_s12   ;;  %s223_s16 = sadd.s32 1, %s1250_s11 }
   0x5   : > { %s220_s17 = ssub.s32 %s1254_s12, %s1333_s15  ;;  %p233_p0 = scmp.ne.s32.totalorder %s1250_s11, %s1246_s10 }
   0x6   : > { %p221_p1 = scmp.eq.s32.totalorder %s220_s17, 0  ;;  %p234_p2 = scmp.eq.s32.totalorder %s1329_s13, 3 }
   0x7   : > { %p239_p3 = scmp.ne.s32.totalorder %s1246_s10, %s1242_s30  ;;  %p240_p4 = scmp.eq.s32.totalorder %s986_s14, 3 }
   0x8   : > { %s1344_s18 = scalar_select %p221_p1, %s1250_s11, %s223_s16  }
   0x9   : > { %p1346_p5 = por %p234_p2, %p233_p0  ;;  %p1350_p6 = por %p240_p4, %p239_p3 }
   0xa   : > { %p989_p7 = scmp.ge.s32.totalorder %s1254_s12, 1  ;;  %p291_p8 = scmp.lt.s32.totalorder %s1254_s12, 5 }
   0xc   : > { %p292_p9 = pnand %p989_p7, %p291_p8 }
   0xd   : > { %s991_s23 = sshll.u32 (!%p292_p9), %s1329_s13, 4  ;;  %s1146_s22 = sshll.u32 (!%p292_p9), %s1329_s13, 7 }
   0xe   : > { %295 = sbr.rel (%p292_p9) target bundleno = 719 (0x2cf), region = 56  ;;  %p328_p10 = scmp.lt.s32.totalorder (!%p292_p9), %s991_s23, 63 }
   0xf   : > { %s920_s25 = scalar_lea.hbm (!%p292_p9), %s1582_s9, %s1146_s22  ;;  %s1212_s22 = scalar_lea.hbm (!%p292_p9), %s1582_s9, 512 }
  0x10   : > { %s923_s27 = sshll.u32 (!%p292_p9), %s920_s25, 4  ;;  %s924_s27 = int_to_ptr.hbm [resolvable:$true] %s923_s27 }
  0x13   : > { %v1121_v0 = vld [vmem:[%s1574_s1 + $0x18] sm:$0xff]  ;;  %v1120_v1 = vld [vmem:[%s1574_s1 + $0x10] sm:$0xff]  ;;  %s1590_s23 = smov (!%p328_p10, %s991_s23), 63  ;;  %v1119_v2 = vld [vmem:[%s1574_s1 + $0x8] sm:$0xff]  ;;  %vm395_vm0 = vcmask 523264  }
  0x14   : > { %424 = vmatpush.bf16.msra.mxu0 %v1121_v0  ;;  %s992_s26 = sshll.u32 %s1590_s23, 3  ;;  %v1118_v3 = vld [vmem:[%s1574_s1] sm:$0xff]  ;;  %v1129_v19 = vld [vmem:[%s1576_s3 + $0x38] sm:$0xff]  ;;  %v1128_v23 = vld [vmem:[%s1576_s3 + $0x30] sm:$0xff] }
  0x15   : > { %s1369_s16 = scalar_lea.vmem %s1573_s0, %s992_s26  ;;  %561 = vmatpush.bf16.msra.mxu1 %v1129_v19  ;;  %v1127_v24 = vld [vmem:[%s1576_s3 + $0x28] sm:$0xff]  ;;  %v1126_v25 = vld [vmem:[%s1576_s3 + $0x20] sm:$0xff]  ;;  %v1125_v28 = vld [vmem:[%s1576_s3 + $0x18] sm:$0xff] }
  0x16   : > { %v335_v4 = vld [vmem:[%s1369_s16] sm:$0xff]  ;;  %v336_v5 = vld [vmem:[%s1369_s16 + $0x8] sm:$0xff]  ;;  %v337_v7 = vld [vmem:[%s1369_s16 + $0x10] sm:$0xff] }
  0x17   : > { %v351_v6 = vpack.c.bf16 %v336_v5, %v335_v4  ;;  %v338_v8 = vld [vmem:[%s1369_s16 + $0x18] sm:$0xff]  ;;  %v339_v10 = vld [vmem:[%s1369_s16 + $0x20] sm:$0xff]  ;;  %v340_v11 = vld [vmem:[%s1369_s16 + $0x28] sm:$0xff] }
  0x18   : > { %425 = vmatpush.bf16.msra.mxu0 %v1120_v1  ;;  %v352_v9 = vpack.c.bf16 %v338_v8, %v337_v7  ;;  %v353_v12 = vpack.c.bf16 %v340_v11, %v339_v10  ;;  %v341_v13 = vld [vmem:[%s1369_s16 + $0x30] sm:$0xff]  ;;  %v342_v14 = vld [vmem:[%s1369_s16 + $0x38] sm:$0xff]  ;;  %v343_v16 = vld [vmem:[%s1369_s16 + $0x40] sm:$0xff] }
  0x19   : > { %v354_v15 = vpack.c.bf16 %v342_v14, %v341_v13  ;;  %v344_v17 = vld [vmem:[%s1369_s16 + $0x48] sm:$0xff]  ;;  %v345_v20 = vld [vmem:[%s1369_s16 + $0x50] sm:$0xff]  ;;  %v346_v21 = vld [vmem:[%s1369_s16 + $0x58] sm:$0xff]  ;;  %562 = vmatpush.bf16.msra.mxu1 %v1128_v23 }
  0x1a   : > { %v355_v18 = vpack.c.bf16 %v344_v17, %v343_v16  ;;  %v356_v22 = vpack.c.bf16 %v346_v21, %v345_v20  ;;  %v347_v26 = vld [vmem:[%s1369_s16 + $0x60] sm:$0xff]  ;;  %v348_v27 = vld [vmem:[%s1369_s16 + $0x68] sm:$0xff]  ;;  %v1124_v30 = vld [vmem:[%s1576_s3 + $0x10] sm:$0xff] }
  0x1b   : > { %v357_v29 = vpack.c.bf16 %v348_v27, %v347_v26  ;;  %v1123_v31 = vld [vmem:[%s1576_s3 + $0x8] sm:$0xff]  ;;  %v1122_v32 = vld [vmem:[%s1576_s3] sm:$0xff]  ;;  %v349_v33 = vld [vmem:[%s1369_s16 + $0x70] sm:$0xff] }
  0x1c   : > { %426 = vmatpush.bf16.msra.mxu0 %v1119_v2  ;;  %v350_v34 = vld [vmem:[%s1369_s16 + $0x78] sm:$0xff]  ;;  %v1425_v37 = vld [vmem:[%s1575_s2] ss:$0 sm:$0xff]  ;;  %v1136_v16 = vld [vmem:[%s1578_s5 + $0x30] sm:$0xff]  ;;  %s324_s16 = sand.u32 1, %s1246_s10  }
  0x1d   : > { %563 = vmatpush.bf16.msra.mxu1 %v1127_v24  ;;  %v358_v35 = vpack.c.bf16 %v350_v34, %v349_v33  ;;  %v1134_v19 = vld [vmem:[%s1578_s5 + $0x20] sm:$0xff]  ;;  %v1133_v23 = vld [vmem:[%s1578_s5 + $0x18] sm:$0xff]  ;;  %v1132_v27 = vld [vmem:[%s1578_s5 + $0x10] sm:$0xff]  ;;  %s990_s29 = sshll.u32 %s324_s16, 7  ;;  %s909_s28 = scalar_lea.sflag [#allocation3], %s324_s16 }
  0x1e   : > { %s1521_s21 = scalar_lea.vmem [#allocation2], %s990_s29  ;;  %s1206_s29 = sshra.s32 %s924_s27, 4  ;;  %s1207_s29 = int_to_ptr.hbm [resolvable:$true] %s1206_s29 }
  0x1f   : > { %s921_s26 = sshll.u32 %s1521_s21, 4  ;;  %s1208_s13 = scalar_lea.hbm %s1207_s29, 128  ;;  %s922_s26 = int_to_ptr.vmem [resolvable:$true] %s921_s26 }
  0x20   : > { %427 = vmatpush.bf16.msra.mxu0 %v1118_v3  ;;  %p1209_p11 = scmp.ne.s32.totalorder %s1207_s29, %s1208_s13  ;;  %p1213_p0 = scmp.lt.s32.totalorder %s1207_s29, %s1582_s9 }
  0x21   : > { %564 = vmatpush.bf16.msra.mxu1 %v1126_v25  ;;  %p1214_p1 = scmp.lt.s32.totalorder %s1212_s22, %s1208_s13 }
  0x22   : > { %p1210_p12 = pnand %p1209_p11, %p1346_p5 }
  0x23   : > { %1009 = vmatmul.msk.bf16.vlgmr.msra.gmra.mxu0 %vm395_vm0, %v351_v6  ;;  %p1215_p2 = por %p1214_p1, %p1213_p0 }
  0x24   : > { %p1211_p13 = pneg %p1210_p12 }
  0x25   : > { %565 = vmatpush.bf16.msra.mxu1 %v1125_v28 }
  0x26   : > { %p1216_p3 = pnand %p1215_p2, %p1211_p13 }
  0x29   : > { %566 = vmatpush.bf16.msra.mxu1 %v1124_v30  ;;  %v1130_v30 = vld [vmem:[%s1578_s5] sm:$0xff] }
  0x2d   : > { %567 = vmatpush.bf16.msra.mxu1 %v1123_v31 }
  0x31   : > { %568 = vmatpush.bf16.msra.mxu1 %v1122_v32 }
  0x33   : > { %1010 = vmatmul.msk.bf16.gmra.mxu0 %vm395_vm0, %v352_v9 }
  0x43   : > { %1011 = vmatmul.msk.bf16.gmra.mxu0 %vm395_vm0, %v353_v12  ;;  %v1137_v12 = vld [vmem:[%s1578_s5 + $0x38] sm:$0xff] }
  0x44   : > { %702 = vmatpush.bf16.msra.mxu2 %v1137_v12 }
  0x48   : > { %703 = vmatpush.bf16.msra.mxu2 %v1136_v16  ;;  %v1145_v16 = vld [vmem:[%s1580_s7 + $0x38] sm:$0xff] }
  0x49   : > { %843 = vmatpush.bf16.msra.mxu3 %v1145_v16 }
  0x53   : > { %1012 = vmatmul.msk.bf16.gmra.mxu0 %vm395_vm0, %v354_v15 }
  0x63   : > { %1013 = vmatmul.msk.bf16.gmra.mxu0 %vm395_vm0, %v355_v18  ;;  %v1135_v18 = vld [vmem:[%s1578_s5 + $0x28] sm:$0xff] }
  0x64   : > { %704 = vmatpush.bf16.msra.mxu2 %v1135_v18  ;;  %v1144_v18 = vld [vmem:[%s1580_s7 + $0x30] sm:$0xff] }
  0x65   : > { %844 = vmatpush.bf16.msra.mxu3 %v1144_v18 }
  0x68   : > { %705 = vmatpush.bf16.msra.mxu2 %v1134_v19  ;;  %v1143_v19 = vld [vmem:[%s1580_s7 + $0x28] sm:$0xff] }
  0x69   : > { %845 = vmatpush.bf16.msra.mxu3 %v1143_v19 }
  0x6c   : > { %706 = vmatpush.bf16.msra.mxu2 %v1133_v23  ;;  %v1142_v23 = vld [vmem:[%s1580_s7 + $0x20] sm:$0xff] }
  0x6d   : > { %846 = vmatpush.bf16.msra.mxu3 %v1142_v23 }
  0x70   : > { %707 = vmatpush.bf16.msra.mxu2 %v1132_v27 }
  0x73   : > { %1014 = vmatmul.msk.bf16.gmra.mxu0 %vm395_vm0, %v356_v22 }
  0x83   : > { %1015 = vmatmul.msk.bf16.gmra.mxu0 %vm395_vm0, %v357_v29  ;;  %v1131_v29 = vld [vmem:[%s1578_s5 + $0x8] sm:$0xff] }
  0x84   : > { %708 = vmatpush.bf16.msra.mxu2 %v1131_v29  ;;  %v1140_v29 = vld [vmem:[%s1580_s7 + $0x10] sm:$0xff] }
  0x88   : > { %709 = vmatpush.bf16.msra.mxu2 %v1130_v30 }
  0x93   : > { %1016 = vmatmul.msk.bf16.gmra.mxu0 %vm395_vm0, %v358_v35 }
  0xa0   : > { %v429_v36 = vpop.f32.mrf.mxu0 }
  0xa1   : > { %v430_v38 = vadd.f32 %v1425_v37, %v429_v36 }
  0xa3   : > { %v469_v41 = vmax.f32 %v430_v38, 0.0 }
  0xa8   : > { %v431_v39 = vpop.f32.mrf.mxu0 }
  0xa9   : > { %v432_v40 = vadd.f32 %v1425_v37, %v431_v39  ;;  %v1470_v39 = vld [vmem:[%s1577_s4] ss:$0 sm:$0xff] }
  0xab   : > { %v470_v42 = vmax.f32 %v432_v40, 0.0 }
  0xad   : > { %v485_v43 = vpack.c.bf16 %v470_v42, %v469_v41 }
  0xaf   : > { %569 = vmatmul.bf16.vlgmr.msra.gmra.mxu1 %v485_v43 }
  0xb0   : > { %v434_v44 = vpop.f32.mrf.mxu0 }
  0xb1   : > { %v435_v45 = vadd.f32 %v1425_v37, %v434_v44 }
  0xb3   : > { %v471_v48 = vmax.f32 %v435_v45, 0.0 }
  0xb8   : > { %v436_v46 = vpop.f32.mrf.mxu0 }
  0xb9   : > { %v437_v47 = vadd.f32 %v1425_v37, %v436_v46 }
  0xbb   : > { %v472_v49 = vmax.f32 %v437_v47, 0.0 }
  0xbd   : > { %v486_v50 = vpack.c.bf16 %v472_v49, %v471_v48 }
  0xbf   : > { %574 = vmatmul.bf16.gmra.mxu1 %v486_v50 }
  0xc0   : > { %v439_v51 = vpop.f32.mrf.mxu0 }
  0xc1   : > { %v440_v52 = vadd.f32 %v1425_v37, %v439_v51 }
  0xc3   : > { %v473_v55 = vmax.f32 %v440_v52, 0.0 }
  0xc8   : > { %v441_v53 = vpop.f32.mrf.mxu0 }
  0xc9   : > { %v442_v54 = vadd.f32 %v1425_v37, %v441_v53 }
  0xcb   : > { %v474_v56 = vmax.f32 %v442_v54, 0.0 }
  0xcd   : > { %v487_v57 = vpack.c.bf16 %v474_v56, %v473_v55 }
  0xcf   : > { %579 = vmatmul.bf16.gmra.mxu1 %v487_v57 }
  0xd0   : > { %v444_v58 = vpop.f32.mrf.mxu0 }
  0xd1   : > { %v445_v59 = vadd.f32 %v1425_v37, %v444_v58 }
  0xd3   : > { %v475_v62 = vmax.f32 %v445_v59, 0.0 }
  0xd8   : > { %v446_v60 = vpop.f32.mrf.mxu0 }
  0xd9   : > { %v447_v61 = vadd.f32 %v1425_v37, %v446_v60 }
  0xdb   : > { %v476_v63 = vmax.f32 %v447_v61, 0.0 }
  0xdd   : > { %v488_v0 = vpack.c.bf16 %v476_v63, %v475_v62 }
  0xdf   : > { %584 = vmatmul.bf16.gmra.mxu1 %v488_v0 }
  0xe0   : > { %v449_v1 = vpop.f32.mrf.mxu0 }
  0xe1   : > { %v450_v2 = vadd.f32 %v1425_v37, %v449_v1 }
  0xe3   : > { %v477_v5 = vmax.f32 %v450_v2, 0.0 }
  0xe8   : > { %v451_v3 = vpop.f32.mrf.mxu0 }
  0xe9   : > { %v452_v4 = vadd.f32 %v1425_v37, %v451_v3 }
  0xeb   : > { %v478_v6 = vmax.f32 %v452_v4, 0.0 }
  0xed   : > { %v489_v7 = vpack.c.bf16 %v478_v6, %v477_v5 }
  0xef   : > { %589 = vmatmul.bf16.gmra.mxu1 %v489_v7 }
  0xf0   : > { %v454_v8 = vpop.f32.mrf.mxu0 }
  0xf1   : > { %v455_v9 = vadd.f32 %v1425_v37, %v454_v8 }
  0xf3   : > { %v479_v13 = vmax.f32 %v455_v9, 0.0 }
  0xf8   : > { %v456_v10 = vpop.f32.mrf.mxu0 }
  0xf9   : > { %v457_v11 = vadd.f32 %v1425_v37, %v456_v10 }
  0xfb   : > { %v480_v14 = vmax.f32 %v457_v11, 0.0 }
  0xfd   : > { %v490_v15 = vpack.c.bf16 %v480_v14, %v479_v13 }
  0xff   : > { %594 = vmatmul.bf16.gmra.mxu1 %v490_v15 }
 0x100   : > { %v459_v17 = vpop.f32.mrf.mxu0 }
 0x101   : > { %v460_v20 = vadd.f32 %v1425_v37, %v459_v17 }
 0x103   : > { %v481_v24 = vmax.f32 %v460_v20, 0.0 }
 0x108   : > { %v461_v21 = vpop.f32.mrf.mxu0 }
 0x109   : > { %v462_v22 = vadd.f32 %v1425_v37, %v461_v21 }
 0x10b   : > { %v482_v25 = vmax.f32 %v462_v22, 0.0 }
 0x10d   : > { %v491_v26 = vpack.c.bf16 %v482_v25, %v481_v24 }
 0x10f   : > { %599 = vmatmul.bf16.gmra.mxu1 %v491_v26 }
 0x110   : > { %v464_v28 = vpop.f32.mrf.mxu0 }
 0x111   : > { %v465_v31 = vadd.f32 %v1425_v37, %v464_v28  ;;  %v1141_v28 = vld [vmem:[%s1580_s7 + $0x18] sm:$0xff] }
 0x112   : > { %847 = vmatpush.bf16.msra.mxu3 %v1141_v28 }
 0x113   : > { %v483_v34 = vmax.f32 %v465_v31, 0.0 }
 0x116   : > { %848 = vmatpush.bf16.msra.mxu3 %v1140_v29 }
 0x118   : > { %v466_v32 = vpop.f32.mrf.mxu0 }
 0x119   : > { %v467_v33 = vadd.f32 %v1425_v37, %v466_v32  ;;  %v1139_v32 = vld [vmem:[%s1580_s7 + $0x8] sm:$0xff] }
 0x11a   : > { %849 = vmatpush.bf16.msra.mxu3 %v1139_v32 }
 0x11b   : > { %v484_v35 = vmax.f32 %v467_v33, 0.0 }
 0x11d   : > { %v492_v36 = vpack.c.bf16 %v484_v35, %v483_v34 }
 0x11f   : > { %604 = vmatmul.bf16.gmra.mxu1 %v492_v36  ;;  %v1138_v36 = vld [vmem:[%s1580_s7] sm:$0xff] }
 0x120   : > { %850 = vmatpush.bf16.msra.mxu3 %v1138_v36 }
 0x12c   : > { %v570_v38 = vpop.f32.mrf.mxu1 }
 0x12d   : > { %v571_v40 = vadd.f32 %v1470_v39, %v570_v38 }
 0x12f   : > { %v610_v43 = vmax.f32 %v571_v40, 0.0 }
 0x134   : > { %v572_v41 = vpop.f32.mrf.mxu1 }
 0x135   : > { %v573_v42 = vadd.f32 %v1470_v39, %v572_v41  ;;  %v1190_v41 = vld [vmem:[%s1579_s6] ss:$0 sm:$0xff] }
 0x137   : > { %v611_v44 = vmax.f32 %v573_v42, 0.0 }
 0x139   : > { %v626_v45 = vpack.c.bf16 %v611_v44, %v610_v43 }
 0x13b   : > { %710 = vmatmul.bf16.vlgmr.msra.gmra.mxu2 %v626_v45 }
 0x13c   : > { %v575_v37 = vpop.f32.mrf.mxu1 }
 0x13d   : > { %v576_v46 = vadd.f32 %v1470_v39, %v575_v37 }
 0x13f   : > { %v612_v49 = vmax.f32 %v576_v46, 0.0 }
 0x144   : > { %v577_v47 = vpop.f32.mrf.mxu1 }
 0x145   : > { %v578_v48 = vadd.f32 %v1470_v39, %v577_v47 }
 0x147   : > { %v613_v50 = vmax.f32 %v578_v48, 0.0 }
 0x149   : > { %v627_v51 = vpack.c.bf16 %v613_v50, %v612_v49 }
 0x14b   : > { %715 = vmatmul.bf16.gmra.mxu2 %v627_v51 }
 0x14c   : > { %v580_v52 = vpop.f32.mrf.mxu1 }
 0x14d   : > { %v581_v53 = vadd.f32 %v1470_v39, %v580_v52 }
 0x14f   : > { %v614_v56 = vmax.f32 %v581_v53, 0.0 }
 0x154   : > { %v582_v54 = vpop.f32.mrf.mxu1 }
 0x155   : > { %v583_v55 = vadd.f32 %v1470_v39, %v582_v54 }
 0x157   : > { %v615_v57 = vmax.f32 %v583_v55, 0.0 }
 0x159   : > { %v628_v58 = vpack.c.bf16 %v615_v57, %v614_v56 }
 0x15b   : > { %720 = vmatmul.bf16.gmra.mxu2 %v628_v58 }
 0x15c   : > { %v585_v59 = vpop.f32.mrf.mxu1 }
 0x15d   : > { %v586_v60 = vadd.f32 %v1470_v39, %v585_v59 }
 0x15f   : > { %v616_v63 = vmax.f32 %v586_v60, 0.0 }
 0x164   : > { %v587_v61 = vpop.f32.mrf.mxu1 }
 0x165   : > { %v588_v62 = vadd.f32 %v1470_v39, %v587_v61 }
 0x167   : > { %v617_v0 = vmax.f32 %v588_v62, 0.0 }
 0x169   : > { %v629_v1 = vpack.c.bf16 %v617_v0, %v616_v63 }
 0x16b   : > { %725 = vmatmul.bf16.gmra.mxu2 %v629_v1 }
 0x16c   : > { %v590_v2 = vpop.f32.mrf.mxu1 }
 0x16d   : > { %v591_v3 = vadd.f32 %v1470_v39, %v590_v2 }
 0x16f   : > { %v618_v6 = vmax.f32 %v591_v3, 0.0 }
 0x174   : > { %v592_v4 = vpop.f32.mrf.mxu1 }
 0x175   : > { %v593_v5 = vadd.f32 %v1470_v39, %v592_v4 }
 0x177   : > { %v619_v7 = vmax.f32 %v593_v5, 0.0 }
 0x179   : > { %v630_v8 = vpack.c.bf16 %v619_v7, %v618_v6 }
 0x17b   : > { %730 = vmatmul.bf16.gmra.mxu2 %v630_v8 }
 0x17c   : > { %v595_v9 = vpop.f32.mrf.mxu1 }
 0x17d   : > { %v596_v10 = vadd.f32 %v1470_v39, %v595_v9 }
 0x17f   : > { %v620_v13 = vmax.f32 %v596_v10, 0.0 }
 0x184   : > { %v597_v11 = vpop.f32.mrf.mxu1 }
 0x185   : > { %v598_v12 = vadd.f32 %v1470_v39, %v597_v11 }
 0x187   : > { %v621_v14 = vmax.f32 %v598_v12, 0.0 }
 0x189   : > { %v631_v15 = vpack.c.bf16 %v621_v14, %v620_v13 }
 0x18b   : > { %735 = vmatmul.bf16.gmra.mxu2 %v631_v15 }
 0x18c   : > { %v600_v17 = vpop.f32.mrf.mxu1 }
 0x18d   : > { %v601_v20 = vadd.f32 %v1470_v39, %v600_v17 }
 0x18f   : > { %v622_v24 = vmax.f32 %v601_v20, 0.0 }
 0x194   : > { %v602_v21 = vpop.f32.mrf.mxu1 }
 0x195   : > { %v603_v22 = vadd.f32 %v1470_v39, %v602_v21 }
 0x197   : > { %v623_v25 = vmax.f32 %v603_v22, 0.0 }
 0x199   : > { %v632_v26 = vpack.c.bf16 %v623_v25, %v622_v24 }
 0x19b   : > { %740 = vmatmul.bf16.gmra.mxu2 %v632_v26 }
 0x19c   : > { %v605_v27 = vpop.f32.mrf.mxu1 }
 0x19d   : > { %v606_v30 = vadd.f32 %v1470_v39, %v605_v27 }
 0x19f   : > { %v624_v34 = vmax.f32 %v606_v30, 0.0 }
 0x1a4   : > { %v607_v31 = vpop.f32.mrf.mxu1 }
 0x1a5   : > { %v608_v33 = vadd.f32 %v1470_v39, %v607_v31  ;;  %v1191_v31 = vld [vmem:[%s1581_s8] ss:$0 sm:$0xff] }
 0x1a7   : > { %v625_v35 = vmax.f32 %v608_v33, 0.0 }
 0x1a9   : > { %v633_v38 = vpack.c.bf16 %v625_v35, %v624_v34 }
 0x1ab   : > { %745 = vmatmul.bf16.gmra.mxu2 %v633_v38 }
 0x1be   : > { %v711_v40 = vpop.f32.mrf.mxu2 }
 0x1bf   : > { %v712_v42 = vadd.f32 %v1190_v41, %v711_v40 }
 0x1c1   : > { %v751_v45 = vmax.f32 %v712_v42, 0.0 }
 0x1c6   : > { %v713_v43 = vpop.f32.mrf.mxu2 }
 0x1c7   : > { %v714_v44 = vadd.f32 %v1190_v41, %v713_v43 }
 0x1c9   : > { %v752_v39 = vmax.f32 %v714_v44, 0.0 }
 0x1cb   : > { %v767_v37 = vpack.c.bf16 %v752_v39, %v751_v45 }
 0x1cd   : > { %851 = vmatmul.bf16.vlgmr.msra.gmra.mxu3 %v767_v37 }
 0x1ce   : > { %v716_v46 = vpop.f32.mrf.mxu2 }
 0x1cf   : > { %v717_v47 = vadd.f32 %v1190_v41, %v716_v46 }
 0x1d1   : > { %v753_v50 = vmax.f32 %v717_v47, 0.0 }
 0x1d6   : > { %v718_v48 = vpop.f32.mrf.mxu2 }
 0x1d7   : > { %v719_v49 = vadd.f32 %v1190_v41, %v718_v48 }
 0x1d9   : > { %v754_v51 = vmax.f32 %v719_v49, 0.0 }
 0x1db   : > { %v768_v52 = vpack.c.bf16 %v754_v51, %v753_v50 }
 0x1dd   : > { %856 = vmatmul.bf16.gmra.mxu3 %v768_v52 }
 0x1de   : > { %v721_v53 = vpop.f32.mrf.mxu2 }
 0x1df   : > { %v722_v54 = vadd.f32 %v1190_v41, %v721_v53 }
 0x1e1   : > { %v755_v57 = vmax.f32 %v722_v54, 0.0 }
 0x1e6   : > { %v723_v55 = vpop.f32.mrf.mxu2 }
 0x1e7   : > { %v724_v56 = vadd.f32 %v1190_v41, %v723_v55 }
 0x1e9   : > { %v756_v58 = vmax.f32 %v724_v56, 0.0 }
 0x1eb   : > { %v769_v59 = vpack.c.bf16 %v756_v58, %v755_v57 }
 0x1ed   : > { %861 = vmatmul.bf16.gmra.mxu3 %v769_v59 }
 0x1ee   : > { %v726_v60 = vpop.f32.mrf.mxu2 }
 0x1ef   : > { %v727_v61 = vadd.f32 %v1190_v41, %v726_v60 }
 0x1f1   : > { %v757_v0 = vmax.f32 %v727_v61, 0.0 }
 0x1f6   : > { %v728_v62 = vpop.f32.mrf.mxu2 }
 0x1f7   : > { %v729_v63 = vadd.f32 %v1190_v41, %v728_v62 }
 0x1f9   : > { %v758_v1 = vmax.f32 %v729_v63, 0.0 }
 0x1fb   : > { %v770_v2 = vpack.c.bf16 %v758_v1, %v757_v0 }
 0x1fd   : > { %866 = vmatmul.bf16.gmra.mxu3 %v770_v2 }
 0x1fe   : > { %v731_v3 = vpop.f32.mrf.mxu2 }
 0x1ff   : > { %v732_v4 = vadd.f32 %v1190_v41, %v731_v3 }
 0x201   : > { %v759_v7 = vmax.f32 %v732_v4, 0.0 }
 0x206   : > { %v733_v5 = vpop.f32.mrf.mxu2 }
 0x207   : > { %v734_v6 = vadd.f32 %v1190_v41, %v733_v5 }
 0x209   : > { %v760_v8 = vmax.f32 %v734_v6, 0.0 }
 0x20b   : > { %v771_v9 = vpack.c.bf16 %v760_v8, %v759_v7 }
 0x20d   : > { %871 = vmatmul.bf16.gmra.mxu3 %v771_v9 }
 0x20e   : > { %v736_v10 = vpop.f32.mrf.mxu2 }
 0x20f   : > { %v737_v11 = vadd.f32 %v1190_v41, %v736_v10 }
 0x211   : > { %v761_v14 = vmax.f32 %v737_v11, 0.0 }
 0x216   : > { %v738_v12 = vpop.f32.mrf.mxu2 }
 0x217   : > { %v739_v13 = vadd.f32 %v1190_v41, %v738_v12 }
 0x219   : > { %v762_v15 = vmax.f32 %v739_v13, 0.0 }
 0x21b   : > { %v772_v16 = vpack.c.bf16 %v762_v15, %v761_v14 }
 0x21d   : > { %876 = vmatmul.bf16.gmra.mxu3 %v772_v16 }
 0x21e   : > { %v741_v17 = vpop.f32.mrf.mxu2 }
 0x21f   : > { %v742_v18 = vadd.f32 %v1190_v41, %v741_v17 }
 0x221   : > { %v763_v21 = vmax.f32 %v742_v18, 0.0 }
 0x226   : > { %v743_v19 = vpop.f32.mrf.mxu2 }
 0x227   : > { %v744_v20 = vadd.f32 %v1190_v41, %v743_v19 }
 0x229   : > { %v764_v22 = vmax.f32 %v744_v20, 0.0 }
 0x22b   : > { %v773_v23 = vpack.c.bf16 %v764_v22, %v763_v21 }
 0x22d   : > { %881 = vmatmul.bf16.gmra.mxu3 %v773_v23 }
 0x22e   : > { %v746_v24 = vpop.f32.mrf.mxu2 }
 0x22f   : > { %v747_v25 = vadd.f32 %v1190_v41, %v746_v24 }
 0x231   : > { %v765_v28 = vmax.f32 %v747_v25, 0.0 }
 0x236   : > { %v748_v26 = vpop.f32.mrf.mxu2 }
 0x237   : > { %v749_v27 = vadd.f32 %v1190_v41, %v748_v26 }
 0x239   : > { %v766_v29 = vmax.f32 %v749_v27, 0.0 }
 0x23b   : > { %v774_v30 = vpack.c.bf16 %v766_v29, %v765_v28 }
 0x23d   : > { %886 = vmatmul.bf16.gmra.mxu3 %v774_v30 }
 0x250   : > { %v852_v32 = vpop.f32.mrf.mxu3 }
 0x251   : > { %v853_v33 = vadd.f32 %v1191_v31, %v852_v32 }
 0x253   : > { %892 = vst [vmem:[%s1521_s21] sm:$0xff] %v853_v33 }
 0x258   : > { %v854_v34 = vpop.f32.mrf.mxu3 }
 0x259   : > { %v855_v35 = vadd.f32 %v1191_v31, %v854_v34 }
 0x25b   : > { %893 = vst [vmem:[%s1521_s21 + $0x8] sm:$0xff] %v855_v35 }
 0x260   : > { %v857_v36 = vpop.f32.mrf.mxu3 }
 0x261   : > { %v858_v38 = vadd.f32 %v1191_v31, %v857_v36 }
 0x263   : > { %894 = vst [vmem:[%s1521_s21 + $0x10] sm:$0xff] %v858_v38 }
 0x268   : > { %v859_v40 = vpop.f32.mrf.mxu3 }
 0x269   : > { %v860_v41 = vadd.f32 %v1191_v31, %v859_v40 }
 0x26b   : > { %895 = vst [vmem:[%s1521_s21 + $0x18] sm:$0xff] %v860_v41 }
 0x270   : > { %v862_v42 = vpop.f32.mrf.mxu3 }
 0x271   : > { %v863_v43 = vadd.f32 %v1191_v31, %v862_v42 }
 0x273   : > { %896 = vst [vmem:[%s1521_s21 + $0x20] sm:$0xff] %v863_v43 }
 0x278   : > { %v864_v44 = vpop.f32.mrf.mxu3 }
 0x279   : > { %v865_v45 = vadd.f32 %v1191_v31, %v864_v44 }
 0x27b   : > { %897 = vst [vmem:[%s1521_s21 + $0x28] sm:$0xff] %v865_v45 }
 0x280   : > { %v867_v39 = vpop.f32.mrf.mxu3 }
 0x281   : > { %v868_v37 = vadd.f32 %v1191_v31, %v867_v39 }
 0x283   : > { %898 = vst [vmem:[%s1521_s21 + $0x30] sm:$0xff] %v868_v37 }
 0x288   : > { %v869_v46 = vpop.f32.mrf.mxu3 }
 0x289   : > { %v870_v47 = vadd.f32 %v1191_v31, %v869_v46 }
 0x28b   : > { %899 = vst [vmem:[%s1521_s21 + $0x38] sm:$0xff] %v870_v47 }
 0x290   : > { %v872_v48 = vpop.f32.mrf.mxu3 }
 0x291   : > { %v873_v49 = vadd.f32 %v1191_v31, %v872_v48 }
 0x293   : > { %900 = vst [vmem:[%s1521_s21 + $0x40] sm:$0xff] %v873_v49 }
 0x298   : > { %v874_v50 = vpop.f32.mrf.mxu3 }
 0x299   : > { %v875_v51 = vadd.f32 %v1191_v31, %v874_v50 }
 0x29b   : > { %901 = vst [vmem:[%s1521_s21 + $0x48] sm:$0xff] %v875_v51 }
 0x2a0   : > { %v877_v52 = vpop.f32.mrf.mxu3 }
 0x2a1   : > { %v878_v53 = vadd.f32 %v1191_v31, %v877_v52 }
 0x2a3   : > { %902 = vst [vmem:[%s1521_s21 + $0x50] sm:$0xff] %v878_v53 }
 0x2a8   : > { %v879_v54 = vpop.f32.mrf.mxu3 }
 0x2a9   : > { %v880_v55 = vadd.f32 %v1191_v31, %v879_v54 }
 0x2ab   : > { %903 = vst [vmem:[%s1521_s21 + $0x58] sm:$0xff] %v880_v55 }
 0x2b0   : > { %v882_v56 = vpop.f32.mrf.mxu3 }
 0x2b1   : > { %v883_v57 = vadd.f32 %v1191_v31, %v882_v56 }
 0x2b3   : > { %904 = vst [vmem:[%s1521_s21 + $0x60] sm:$0xff] %v883_v57 }
 0x2b8   : > { %v884_v58 = vpop.f32.mrf.mxu3 }
 0x2b9   : > { %v885_v59 = vadd.f32 %v1191_v31, %v884_v58 }
 0x2bb   : > { %905 = vst [vmem:[%s1521_s21 + $0x68] sm:$0xff] %v885_v59 }
 0x2c0   : > { %v887_v60 = vpop.f32.mrf.mxu3 }
 0x2c1   : > { %v888_v61 = vadd.f32 %v1191_v31, %v887_v60 }
 0x2c3   : > { %906 = vst [vmem:[%s1521_s21 + $0x70] sm:$0xff] %v888_v61 }
 0x2c8   : > { %v889_v62 = vpop.f32.mrf.mxu3 }
 0x2c9   : > { %v890_v63 = vadd.f32 %v1191_v31, %v889_v62 }
 0x2cb   : > { %907 = vst [vmem:[%s1521_s21 + $0x78] sm:$0xff] %v890_v63 }
 0x2cc   : > { %1219 = shalt.err (!%p1216_p3)
}
 0x2cd   : > { %s1256_s16 = smov 128   ;;  %s1257_s21 = smov 8  }
 0x2ce   : > { %1147 = dma.vmem_to_hbm [thread:$0]  (%p1346_p5), %s922_s26, 2048, %s924_s27, %s909_s28, %s1256_s16, %s1256_s16, %s1257_s21  }
 0x2cf PF: > { %p1153_p4 = scmp.ge.s32.totalorder %s1254_s12, 2  ;;  %s938_s25 = sand.u32 1, %s1242_s30  }
 0x2d0   : > { %s939_s14 = scalar_lea.sflag [#allocation3], %s938_s25 }
 0x2d1   : > { %p1150_p7 = pnand %p1153_p4, %p1350_p6 }
 0x2d3   : > { %p1151_p8 = pneg %p1150_p7 }
 0x2d5   : > { %1237 = dma.done.wait (%p1151_p8), %s939_s14, 2048  }
 0x2d6   : > { %1239 = vsyncadd (%p1151_p8), %s939_s14, 4294965248  ;;  %p19_p9 = scmp.ge.s32.totalorder %s1333_s15, 6   ;;  %s1585_s30 = smov %s1246_s10 }
 0x2d7   : > { %s1586_s10 = smov %s1250_s11  ;;  %s1587_s11 = smov %s1344_s18 }
 0x2d8   : > { %s1588_s12 = smov %s1333_s15  ;;  %21 = sbr.rel (!%p19_p9) target bundleno = 3 (0x3), region = 91 }
 0x2dd   :  { %945 = vsyncpa [#allocation3], 1 }
 0x2de   :  { %947 = vsyncpa [#allocation3 + $0x1], 1 }

// kernel: tpu_custom_call.1
= control target key start
LH: loop header
LB: loop body
LE: loop exit
PB: predicated region body
PF: predicated region fallthrough
CT: control target
= control target key end

     0   :  { %14 = vsyncpa [#allocation3], 0  ;;  %s1573_s0 = inlined_call_operand.vmem [shape: f32[512,64], index: 0, kind: input, shape index: {}]   ;;  %s1574_s1 = inlined_call_operand.vmem [shape: bf16[64,128], index: 1, kind: input, shape index: {}]   ;;  %s1575_s2 = inlined_call_operand.vmem [shape: f32[1,128], index: 2, kind: input, shape index: {}]   ;;  %s1576_s3 = inlined_call_operand.vmem [shape: bf16[128,128], index: 3, kind: input, shape index: {}]   ;;  %s1577_s4 = inlined_call_operand.vmem [shape: f32[1,128], index: 4, kind: input, shape index: {}]   ;;  %s1578_s5 = inlined_call_operand.vmem [shape: bf16[128,128], index: 5, kind: input, shape index: {}]   ;;  %s1579_s6 = inlined_call_operand.vmem [shape: f32[1,128], index: 6, kind: input, shape index: {}]   ;;  %s1580_s7 = inlined_call_operand.vmem [shape: bf16[128,128], index: 7, kind: input, shape index: {}]   ;;  %s1581_s8 = inlined_call_operand.vmem [shape: f32[1,128], index: 8, kind: input, shape index: {}]   ;;  %s1582_s9 = inlined_call_operand.hbm [shape: f32[512,128], index: 9, kind: output, shape index: {}]  }
   0x1   :  { %16 = vsyncpa [#allocation3 + $0x1], 0  ;;  %s1308_s30 = smov 0   ;;  %s1310_s10 = smov 0  }
   0x2   :  { %s1312_s11 = smov 0   ;;  %s1314_s12 = smov 0  }
   0x3 LB: > { %s1329_s13 = sadd.s32 4294967295, %s1254_s12   ;;  %s986_s14 = sadd.s32 4294967294, %s1254_s12   ;;  %s1254_s12 = sphi %s1314_s12, %s1588_s12   ;;  %s1250_s11 = sphi %s1312_s11, %s1587_s11   ;;  %s1246_s10 = sphi %s1310_s10, %s1586_s10   ;;  %s1242_s30 = sphi %s1308_s30, %s1585_s30  }
   0x4   : > { %s1333_s15 = sadd.s32 1, %s1254_s12   ;;  %s223_s16 = sadd.s32 1, %s1250_s11 }
   0x5   : > { %s220_s17 = ssub.s32 %s1254_s12, %s1333_s15  ;;  %p233_p0 = scmp.ne.s32.totalorder %s1250_s11, %s1246_s10 }
   0x6   : > { %p221_p1 = scmp.eq.s32.totalorder %s220_s17, 0  ;;  %p234_p2 = scmp.eq.s32.totalorder %s1329_s13, 3 }
   0x7   : > { %p239_p3 = scmp.ne.s32.totalorder %s1246_s10, %s1242_s30  ;;  %p240_p4 = scmp.eq.s32.totalorder %s986_s14, 3 }
   0x8   : > { %s1344_s18 = scalar_select %p221_p1, %s1250_s11, %s223_s16  }
   0x9   : > { %p1346_p5 = por %p234_p2, %p233_p0  ;;  %p1350_p6 = por %p240_p4, %p239_p3 }
   0xa   : > { %p989_p7 = scmp.ge.s32.totalorder %s1254_s12, 1  ;;  %p291_p8 = scmp.lt.s32.totalorder %s1254_s12, 5 }
   0xc   : > { %p292_p9 = pnand %p989_p7, %p291_p8 }
   0xd   : > { %s991_s23 = sshll.u32 (!%p292_p9), %s1329_s13, 4  ;;  %s1146_s22 = sshll.u32 (!%p292_p9), %s1329_s13, 7 }
   0xe   : > { %295 = sbr.rel (%p292_p9) target bundleno = 719 (0x2cf), region = 56  ;;  %p328_p10 = scmp.lt.s32.totalorder (!%p292_p9), %s991_s23, 63 }
   0xf   : > { %s920_s25 = scalar_lea.hbm (!%p292_p9), %s1582_s9, %s1146_s22  ;;  %s1212_s22 = scalar_lea.hbm (!%p292_p9), %s1582_s9, 512 }
  0x10   : > { %s923_s27 = sshll.u32 (!%p292_p9), %s920_s25, 4  ;;  %s924_s27 = int_to_ptr.hbm [resolvable:$true] %s923_s27 }
  0x13   : > { %v1121_v0 = vld [vmem:[%s1574_s1 + $0x18] sm:$0xff]  ;;  %v1120_v1 = vld [vmem:[%s1574_s1 + $0x10] sm:$0xff]  ;;  %s1590_s23 = smov (!%p328_p10, %s991_s23), 63  ;;  %v1119_v2 = vld [vmem:[%s1574_s1 + $0x8] sm:$0xff]  ;;  %vm395_vm0 = vcmask 523264  }
  0x14   : > { %424 = vmatpush.bf16.msra.mxu0 %v1121_v0  ;;  %s992_s26 = sshll.u32 %s1590_s23, 3  ;;  %v1118_v3 = vld [vmem:[%s1574_s1] sm:$0xff]  ;;  %v1129_v19 = vld [vmem:[%s1576_s3 + $0x38] sm:$0xff]  ;;  %v1128_v23 = vld [vmem:[%s1576_s3 + $0x30] sm:$0xff] }
  0x15   : > { %s1369_s16 = scalar_lea.vmem %s1573_s0, %s992_s26  ;;  %561 = vmatpush.bf16.msra.mxu1 %v1129_v19  ;;  %v1127_v24 = vld [vmem:[%s1576_s3 + $0x28] sm:$0xff]  ;;  %v1126_v25 = vld [vmem:[%s1576_s3 + $0x20] sm:$0xff]  ;;  %v1125_v28 = vld [vmem:[%s1576_s3 + $0x18] sm:$0xff] }
  0x16   : > { %v335_v4 = vld [vmem:[%s1369_s16] sm:$0xff]  ;;  %v336_v5 = vld [vmem:[%s1369_s16 + $0x8] sm:$0xff]  ;;  %v337_v7 = vld [vmem:[%s1369_s16 + $0x10] sm:$0xff] }
  0x17   : > { %v351_v6 = vpack.c.bf16 %v336_v5, %v335_v4  ;;  %v338_v8 = vld [vmem:[%s1369_s16 + $0x18] sm:$0xff]  ;;  %v339_v10 = vld [vmem:[%s1369_s16 + $0x20] sm:$0xff]  ;;  %v340_v11 = vld [vmem:[%s1369_s16 + $0x28] sm:$0xff] }
  0x18   : > { %425 = vmatpush.bf16.msra.mxu0 %v1120_v1  ;;  %v352_v9 = vpack.c.bf16 %v338_v8, %v337_v7  ;;  %v353_v12 = vpack.c.bf16 %v340_v11, %v339_v10  ;;  %v341_v13 = vld [vmem:[%s1369_s16 + $0x30] sm:$0xff]  ;;  %v342_v14 = vld [vmem:[%s1369_s16 + $0x38] sm:$0xff]  ;;  %v343_v16 = vld [vmem:[%s1369_s16 + $0x40] sm:$0xff] }
  0x19   : > { %v354_v15 = vpack.c.bf16 %v342_v14, %v341_v13  ;;  %v344_v17 = vld [vmem:[%s1369_s16 + $0x48] sm:$0xff]  ;;  %v345_v20 = vld [vmem:[%s1369_s16 + $0x50] sm:$0xff]  ;;  %v346_v21 = vld [vmem:[%s1369_s16 + $0x58] sm:$0xff]  ;;  %562 = vmatpush.bf16.msra.mxu1 %v1128_v23 }
  0x1a   : > { %v355_v18 = vpack.c.bf16 %v344_v17, %v343_v16  ;;  %v356_v22 = vpack.c.bf16 %v346_v21, %v345_v20  ;;  %v347_v26 = vld [vmem:[%s1369_s16 + $0x60] sm:$0xff]  ;;  %v348_v27 = vld [vmem:[%s1369_s16 + $0x68] sm:$0xff]  ;;  %v1124_v30 = vld [vmem:[%s1576_s3 + $0x10] sm:$0xff] }
  0x1b   : > { %v357_v29 = vpack.c.bf16 %v348_v27, %v347_v26  ;;  %v1123_v31 = vld [vmem:[%s1576_s3 + $0x8] sm:$0xff]  ;;  %v1122_v32 = vld [vmem:[%s1576_s3] sm:$0xff]  ;;  %v349_v33 = vld [vmem:[%s1369_s16 + $0x70] sm:$0xff] }
  0x1c   : > { %426 = vmatpush.bf16.msra.mxu0 %v1119_v2  ;;  %v350_v34 = vld [vmem:[%s1369_s16 + $0x78] sm:$0xff]  ;;  %v1425_v37 = vld [vmem:[%s1575_s2] ss:$0 sm:$0xff]  ;;  %v1136_v16 = vld [vmem:[%s1578_s5 + $0x30] sm:$0xff]  ;;  %s324_s16 = sand.u32 1, %s1246_s10  }
  0x1d   : > { %563 = vmatpush.bf16.msra.mxu1 %v1127_v24  ;;  %v358_v35 = vpack.c.bf16 %v350_v34, %v349_v33  ;;  %v1134_v19 = vld [vmem:[%s1578_s5 + $0x20] sm:$0xff]  ;;  %v1133_v23 = vld [vmem:[%s1578_s5 + $0x18] sm:$0xff]  ;;  %v1132_v27 = vld [vmem:[%s1578_s5 + $0x10] sm:$0xff]  ;;  %s990_s29 = sshll.u32 %s324_s16, 7  ;;  %s909_s28 = scalar_lea.sflag [#allocation3], %s324_s16 }
  0x1e   : > { %s1521_s21 = scalar_lea.vmem [#allocation2], %s990_s29  ;;  %s1206_s29 = sshra.s32 %s924_s27, 4  ;;  %s1207_s29 = int_to_ptr.hbm [resolvable:$true] %s1206_s29 }
  0x1f   : > { %s921_s26 = sshll.u32 %s1521_s21, 4  ;;  %s1208_s13 = scalar_lea.hbm %s1207_s29, 128  ;;  %s922_s26 = int_to_ptr.vmem [resolvable:$true] %s921_s26 }
  0x20   : > { %427 = vmatpush.bf16.msra.mxu0 %v1118_v3  ;;  %p1209_p11 = scmp.ne.s32.totalorder %s1207_s29, %s1208_s13  ;;  %p1213_p0 = scmp.lt.s32.totalorder %s1207_s29, %s1582_s9 }
  0x21   : > { %564 = vmatpush.bf16.msra.mxu1 %v1126_v25  ;;  %p1214_p1 = scmp.lt.s32.totalorder %s1212_s22, %s1208_s13 }
  0x22   : > { %p1210_p12 = pnand %p1209_p11, %p1346_p5 }
  0x23   : > { %1009 = vmatmul.msk.bf16.vlgmr.msra.gmra.mxu0 %vm395_vm0, %v351_v6  ;;  %p1215_p2 = por %p1214_p1, %p1213_p0 }
  0x24   : > { %p1211_p13 = pneg %p1210_p12 }
  0x25   : > { %565 = vmatpush.bf16.msra.mxu1 %v1125_v28 }
  0x26   : > { %p1216_p3 = pnand %p1215_p2, %p1211_p13 }
  0x29   : > { %566 = vmatpush.bf16.msra.mxu1 %v1124_v30  ;;  %v1130_v30 = vld [vmem:[%s1578_s5] sm:$0xff] }
  0x2d   : > { %567 = vmatpush.bf16.msra.mxu1 %v1123_v31 }
  0x31   : > { %568 = vmatpush.bf16.msra.mxu1 %v1122_v32 }
  0x33   : > { %1010 = vmatmul.msk.bf16.gmra.mxu0 %vm395_vm0, %v352_v9 }
  0x43   : > { %1011 = vmatmul.msk.bf16.gmra.mxu0 %vm395_vm0, %v353_v12  ;;  %v1137_v12 = vld [vmem:[%s1578_s5 + $0x38] sm:$0xff] }
  0x44   : > { %702 = vmatpush.bf16.msra.mxu2 %v1137_v12 }
  0x48   : > { %703 = vmatpush.bf16.msra.mxu2 %v1136_v16  ;;  %v1145_v16 = vld [vmem:[%s1580_s7 + $0x38] sm:$0xff] }
  0x49   : > { %843 = vmatpush.bf16.msra.mxu3 %v1145_v16 }
  0x53   : > { %1012 = vmatmul.msk.bf16.gmra.mxu0 %vm395_vm0, %v354_v15 }
  0x63   : > { %1013 = vmatmul.msk.bf16.gmra.mxu0 %vm395_vm0, %v355_v18  ;;  %v1135_v18 = vld [vmem:[%s1578_s5 + $0x28] sm:$0xff] }
  0x64   : > { %704 = vmatpush.bf16.msra.mxu2 %v1135_v18  ;;  %v1144_v18 = vld [vmem:[%s1580_s7 + $0x30] sm:$0xff] }
  0x65   : > { %844 = vmatpush.bf16.msra.mxu3 %v1144_v18 }
  0x68   : > { %705 = vmatpush.bf16.msra.mxu2 %v1134_v19  ;;  %v1143_v19 = vld [vmem:[%s1580_s7 + $0x28] sm:$0xff] }
  0x69   : > { %845 = vmatpush.bf16.msra.mxu3 %v1143_v19 }
  0x6c   : > { %706 = vmatpush.bf16.msra.mxu2 %v1133_v23  ;;  %v1142_v23 = vld [vmem:[%s1580_s7 + $0x20] sm:$0xff] }
  0x6d   : > { %846 = vmatpush.bf16.msra.mxu3 %v1142_v23 }
  0x70   : > { %707 = vmatpush.bf16.msra.mxu2 %v1132_v27 }
  0x73   : > { %1014 = vmatmul.msk.bf16.gmra.mxu0 %vm395_vm0, %v356_v22 }
  0x83   : > { %1015 = vmatmul.msk.bf16.gmra.mxu0 %vm395_vm0, %v357_v29  ;;  %v1131_v29 = vld [vmem:[%s1578_s5 + $0x8] sm:$0xff] }
  0x84   : > { %708 = vmatpush.bf16.msra.mxu2 %v1131_v29  ;;  %v1140_v29 = vld [vmem:[%s1580_s7 + $0x10] sm:$0xff] }
  0x88   : > { %709 = vmatpush.bf16.msra.mxu2 %v1130_v30 }
  0x93   : > { %1016 = vmatmul.msk.bf16.gmra.mxu0 %vm395_vm0, %v358_v35 }
  0xa0   : > { %v429_v36 = vpop.f32.mrf.mxu0 }
  0xa1   : > { %v430_v38 = vadd.f32 %v1425_v37, %v429_v36 }
  0xa3   : > { %v469_v41 = vmax.f32 %v430_v38, 0.0 }
  0xa8   : > { %v431_v39 = vpop.f32.mrf.mxu0 }
  0xa9   : > { %v432_v40 = vadd.f32 %v1425_v37, %v431_v39  ;;  %v1470_v39 = vld [vmem:[%s1577_s4] ss:$0 sm:$0xff] }
  0xab   : > { %v470_v42 = vmax.f32 %v432_v40, 0.0 }
  0xad   : > { %v485_v43 = vpack.c.bf16 %v470_v42, %v469_v41 }
  0xaf   : > { %569 = vmatmul.bf16.vlgmr.msra.gmra.mxu1 %v485_v43 }
  0xb0   : > { %v434_v44 = vpop.f32.mrf.mxu0 }
  0xb1   : > { %v435_v45 = vadd.f32 %v1425_v37, %v434_v44 }
  0xb3   : > { %v471_v48 = vmax.f32 %v435_v45, 0.0 }
  0xb8   : > { %v436_v46 = vpop.f32.mrf.mxu0 }
  0xb9   : > { %v437_v47 = vadd.f32 %v1425_v37, %v436_v46 }
  0xbb   : > { %v472_v49 = vmax.f32 %v437_v47, 0.0 }
  0xbd   : > { %v486_v50 = vpack.c.bf16 %v472_v49, %v471_v48 }
  0xbf   : > { %574 = vmatmul.bf16.gmra.mxu1 %v486_v50 }
  0xc0   : > { %v439_v51 = vpop.f32.mrf.mxu0 }
  0xc1   : > { %v440_v52 = vadd.f32 %v1425_v37, %v439_v51 }
  0xc3   : > { %v473_v55 = vmax.f32 %v440_v52, 0.0 }
  0xc8   : > { %v441_v53 = vpop.f32.mrf.mxu0 }
  0xc9   : > { %v442_v54 = vadd.f32 %v1425_v37, %v441_v53 }
  0xcb   : > { %v474_v56 = vmax.f32 %v442_v54, 0.0 }
  0xcd   : > { %v487_v57 = vpack.c.bf16 %v474_v56, %v473_v55 }
  0xcf   : > { %579 = vmatmul.bf16.gmra.mxu1 %v487_v57 }
  0xd0   : > { %v444_v58 = vpop.f32.mrf.mxu0 }
  0xd1   : > { %v445_v59 = vadd.f32 %v1425_v37, %v444_v58 }
  0xd3   : > { %v475_v62 = vmax.f32 %v445_v59, 0.0 }
  0xd8   : > { %v446_v60 = vpop.f32.mrf.mxu0 }
  0xd9   : > { %v447_v61 = vadd.f32 %v1425_v37, %v446_v60 }
  0xdb   : > { %v476_v63 = vmax.f32 %v447_v61, 0.0 }
  0xdd   : > { %v488_v0 = vpack.c.bf16 %v476_v63, %v475_v62 }
  0xdf   : > { %584 = vmatmul.bf16.gmra.mxu1 %v488_v0 }
  0xe0   : > { %v449_v1 = vpop.f32.mrf.mxu0 }
  0xe1   : > { %v450_v2 = vadd.f32 %v1425_v37, %v449_v1 }
  0xe3   : > { %v477_v5 = vmax.f32 %v450_v2, 0.0 }
  0xe8   : > { %v451_v3 = vpop.f32.mrf.mxu0 }
  0xe9   : > { %v452_v4 = vadd.f32 %v1425_v37, %v451_v3 }
  0xeb   : > { %v478_v6 = vmax.f32 %v452_v4, 0.0 }
  0xed   : > { %v489_v7 = vpack.c.bf16 %v478_v6, %v477_v5 }
  0xef   : > { %589 = vmatmul.bf16.gmra.mxu1 %v489_v7 }
  0xf0   : > { %v454_v8 = vpop.f32.mrf.mxu0 }
  0xf1   : > { %v455_v9 = vadd.f32 %v1425_v37, %v454_v8 }
  0xf3   : > { %v479_v13 = vmax.f32 %v455_v9, 0.0 }
  0xf8   : > { %v456_v10 = vpop.f32.mrf.mxu0 }
  0xf9   : > { %v457_v11 = vadd.f32 %v1425_v37, %v456_v10 }
  0xfb   : > { %v480_v14 = vmax.f32 %v457_v11, 0.0 }
  0xfd   : > { %v490_v15 = vpack.c.bf16 %v480_v14, %v479_v13 }
  0xff   : > { %594 = vmatmul.bf16.gmra.mxu1 %v490_v15 }
 0x100   : > { %v459_v17 = vpop.f32.mrf.mxu0 }
 0x101   : > { %v460_v20 = vadd.f32 %v1425_v37, %v459_v17 }
 0x103   : > { %v481_v24 = vmax.f32 %v460_v20, 0.0 }
 0x108   : > { %v461_v21 = vpop.f32.mrf.mxu0 }
 0x109   : > { %v462_v22 = vadd.f32 %v1425_v37, %v461_v21 }
 0x10b   : > { %v482_v25 = vmax.f32 %v462_v22, 0.0 }
 0x10d   : > { %v491_v26 = vpack.c.bf16 %v482_v25, %v481_v24 }
 0x10f   : > { %599 = vmatmul.bf16.gmra.mxu1 %v491_v26 }
 0x110   : > { %v464_v28 = vpop.f32.mrf.mxu0 }
 0x111   : > { %v465_v31 = vadd.f32 %v1425_v37, %v464_v28  ;;  %v1141_v28 = vld [vmem:[%s1580_s7 + $0x18] sm:$0xff] }
 0x112   : > { %847 = vmatpush.bf16.msra.mxu3 %v1141_v28 }
 0x113   : > { %v483_v34 = vmax.f32 %v465_v31, 0.0 }
 0x116   : > { %848 = vmatpush.bf16.msra.mxu3 %v1140_v29 }
 0x118   : > { %v466_v32 = vpop.f32.mrf.mxu0 }
 0x119   : > { %v467_v33 = vadd.f32 %v1425_v37, %v466_v32  ;;  %v1139_v32 = vld [vmem:[%s1580_s7 + $0x8] sm:$0xff] }
 0x11a   : > { %849 = vmatpush.bf16.msra.mxu3 %v1139_v32 }
 0x11b   : > { %v484_v35 = vmax.f32 %v467_v33, 0.0 }
 0x11d   : > { %v492_v36 = vpack.c.bf16 %v484_v35, %v483_v34 }
 0x11f   : > { %604 = vmatmul.bf16.gmra.mxu1 %v492_v36  ;;  %v1138_v36 = vld [vmem:[%s1580_s7] sm:$0xff] }
 0x120   : > { %850 = vmatpush.bf16.msra.mxu3 %v1138_v36 }
 0x12c   : > { %v570_v38 = vpop.f32.mrf.mxu1 }
 0x12d   : > { %v571_v40 = vadd.f32 %v1470_v39, %v570_v38 }
 0x12f   : > { %v610_v43 = vmax.f32 %v571_v40, 0.0 }
 0x134   : > { %v572_v41 = vpop.f32.mrf.mxu1 }
 0x135   : > { %v573_v42 = vadd.f32 %v1470_v39, %v572_v41  ;;  %v1190_v41 = vld [vmem:[%s1579_s6] ss:$0 sm:$0xff] }
 0x137   : > { %v611_v44 = vmax.f32 %v573_v42, 0.0 }
 0x139   : > { %v626_v45 = vpack.c.bf16 %v611_v44, %v610_v43 }
 0x13b   : > { %710 = vmatmul.bf16.vlgmr.msra.gmra.mxu2 %v626_v45 }
 0x13c   : > { %v575_v37 = vpop.f32.mrf.mxu1 }
 0x13d   : > { %v576_v46 = vadd.f32 %v1470_v39, %v575_v37 }
 0x13f   : > { %v612_v49 = vmax.f32 %v576_v46, 0.0 }
 0x144   : > { %v577_v47 = vpop.f32.mrf.mxu1 }
 0x145   : > { %v578_v48 = vadd.f32 %v1470_v39, %v577_v47 }
 0x147   : > { %v613_v50 = vmax.f32 %v578_v48, 0.0 }
 0x149   : > { %v627_v51 = vpack.c.bf16 %v613_v50, %v612_v49 }
 0x14b   : > { %715 = vmatmul.bf16.gmra.mxu2 %v627_v51 }
 0x14c   : > { %v580_v52 = vpop.f32.mrf.mxu1 }
 0x14d   : > { %v581_v53 = vadd.f32 %v1470_v39, %v580_v52 }
 0x14f   : > { %v614_v56 = vmax.f32 %v581_v53, 0.0 }
 0x154   : > { %v582_v54 = vpop.f32.mrf.mxu1 }
 0x155   : > { %v583_v55 = vadd.f32 %v1470_v39, %v582_v54 }
 0x157   : > { %v615_v57 = vmax.f32 %v583_v55, 0.0 }
 0x159   : > { %v628_v58 = vpack.c.bf16 %v615_v57, %v614_v56 }
 0x15b   : > { %720 = vmatmul.bf16.gmra.mxu2 %v628_v58 }
 0x15c   : > { %v585_v59 = vpop.f32.mrf.mxu1 }
 0x15d   : > { %v586_v60 = vadd.f32 %v1470_v39, %v585_v59 }
 0x15f   : > { %v616_v63 = vmax.f32 %v586_v60, 0.0 }
 0x164   : > { %v587_v61 = vpop.f32.mrf.mxu1 }
 0x165   : > { %v588_v62 = vadd.f32 %v1470_v39, %v587_v61 }
 0x167   : > { %v617_v0 = vmax.f32 %v588_v62, 0.0 }
 0x169   : > { %v629_v1 = vpack.c.bf16 %v617_v0, %v616_v63 }
 0x16b   : > { %725 = vmatmul.bf16.gmra.mxu2 %v629_v1 }
 0x16c   : > { %v590_v2 = vpop.f32.mrf.mxu1 }
 0x16d   : > { %v591_v3 = vadd.f32 %v1470_v39, %v590_v2 }
 0x16f   : > { %v618_v6 = vmax.f32 %v591_v3, 0.0 }
 0x174   : > { %v592_v4 = vpop.f32.mrf.mxu1 }
 0x175   : > { %v593_v5 = vadd.f32 %v1470_v39, %v592_v4 }
 0x177   : > { %v619_v7 = vmax.f32 %v593_v5, 0.0 }
 0x179   : > { %v630_v8 = vpack.c.bf16 %v619_v7, %v618_v6 }
 0x17b   : > { %730 = vmatmul.bf16.gmra.mxu2 %v630_v8 }
 0x17c   : > { %v595_v9 = vpop.f32.mrf.mxu1 }
 0x17d   : > { %v596_v10 = vadd.f32 %v1470_v39, %v595_v9 }
 0x17f   : > { %v620_v13 = vmax.f32 %v596_v10, 0.0 }
 0x184   : > { %v597_v11 = vpop.f32.mrf.mxu1 }
 0x185   : > { %v598_v12 = vadd.f32 %v1470_v39, %v597_v11 }
 0x187   : > { %v621_v14 = vmax.f32 %v598_v12, 0.0 }
 0x189   : > { %v631_v15 = vpack.c.bf16 %v621_v14, %v620_v13 }
 0x18b   : > { %735 = vmatmul.bf16.gmra.mxu2 %v631_v15 }
 0x18c   : > { %v600_v17 = vpop.f32.mrf.mxu1 }
 0x18d   : > { %v601_v20 = vadd.f32 %v1470_v39, %v600_v17 }
 0x18f   : > { %v622_v24 = vmax.f32 %v601_v20, 0.0 }
 0x194   : > { %v602_v21 = vpop.f32.mrf.mxu1 }
 0x195   : > { %v603_v22 = vadd.f32 %v1470_v39, %v602_v21 }
 0x197   : > { %v623_v25 = vmax.f32 %v603_v22, 0.0 }
 0x199   : > { %v632_v26 = vpack.c.bf16 %v623_v25, %v622_v24 }
 0x19b   : > { %740 = vmatmul.bf16.gmra.mxu2 %v632_v26 }
 0x19c   : > { %v605_v27 = vpop.f32.mrf.mxu1 }
 0x19d   : > { %v606_v30 = vadd.f32 %v1470_v39, %v605_v27 }
 0x19f   : > { %v624_v34 = vmax.f32 %v606_v30, 0.0 }
 0x1a4   : > { %v607_v31 = vpop.f32.mrf.mxu1 }
 0x1a5   : > { %v608_v33 = vadd.f32 %v1470_v39, %v607_v31  ;;  %v1191_v31 = vld [vmem:[%s1581_s8] ss:$0 sm:$0xff] }
 0x1a7   : > { %v625_v35 = vmax.f32 %v608_v33, 0.0 }
 0x1a9   : > { %v633_v38 = vpack.c.bf16 %v625_v35, %v624_v34 }
 0x1ab   : > { %745 = vmatmul.bf16.gmra.mxu2 %v633_v38 }
 0x1be   : > { %v711_v40 = vpop.f32.mrf.mxu2 }
 0x1bf   : > { %v712_v42 = vadd.f32 %v1190_v41, %v711_v40 }
 0x1c1   : > { %v751_v45 = vmax.f32 %v712_v42, 0.0 }
 0x1c6   : > { %v713_v43 = vpop.f32.mrf.mxu2 }
 0x1c7   : > { %v714_v44 = vadd.f32 %v1190_v41, %v713_v43 }
 0x1c9   : > { %v752_v39 = vmax.f32 %v714_v44, 0.0 }
 0x1cb   : > { %v767_v37 = vpack.c.bf16 %v752_v39, %v751_v45 }
 0x1cd   : > { %851 = vmatmul.bf16.vlgmr.msra.gmra.mxu3 %v767_v37 }
 0x1ce   : > { %v716_v46 = vpop.f32.mrf.mxu2 }
 0x1cf   : > { %v717_v47 = vadd.f32 %v1190_v41, %v716_v46 }
 0x1d1   : > { %v753_v50 = vmax.f32 %v717_v47, 0.0 }
 0x1d6   : > { %v718_v48 = vpop.f32.mrf.mxu2 }
 0x1d7   : > { %v719_v49 = vadd.f32 %v1190_v41, %v718_v48 }
 0x1d9   : > { %v754_v51 = vmax.f32 %v719_v49, 0.0 }
 0x1db   : > { %v768_v52 = vpack.c.bf16 %v754_v51, %v753_v50 }
 0x1dd   : > { %856 = vmatmul.bf16.gmra.mxu3 %v768_v52 }
 0x1de   : > { %v721_v53 = vpop.f32.mrf.mxu2 }
 0x1df   : > { %v722_v54 = vadd.f32 %v1190_v41, %v721_v53 }
 0x1e1   : > { %v755_v57 = vmax.f32 %v722_v54, 0.0 }
 0x1e6   : > { %v723_v55 = vpop.f32.mrf.mxu2 }
 0x1e7   : > { %v724_v56 = vadd.f32 %v1190_v41, %v723_v55 }
 0x1e9   : > { %v756_v58 = vmax.f32 %v724_v56, 0.0 }
 0x1eb   : > { %v769_v59 = vpack.c.bf16 %v756_v58, %v755_v57 }
 0x1ed   : > { %861 = vmatmul.bf16.gmra.mxu3 %v769_v59 }
 0x1ee   : > { %v726_v60 = vpop.f32.mrf.mxu2 }
 0x1ef   : > { %v727_v61 = vadd.f32 %v1190_v41, %v726_v60 }
 0x1f1   : > { %v757_v0 = vmax.f32 %v727_v61, 0.0 }
 0x1f6   : > { %v728_v62 = vpop.f32.mrf.mxu2 }
 0x1f7   : > { %v729_v63 = vadd.f32 %v1190_v41, %v728_v62 }
 0x1f9   : > { %v758_v1 = vmax.f32 %v729_v63, 0.0 }
 0x1fb   : > { %v770_v2 = vpack.c.bf16 %v758_v1, %v757_v0 }
 0x1fd   : > { %866 = vmatmul.bf16.gmra.mxu3 %v770_v2 }
 0x1fe   : > { %v731_v3 = vpop.f32.mrf.mxu2 }
 0x1ff   : > { %v732_v4 = vadd.f32 %v1190_v41, %v731_v3 }
 0x201   : > { %v759_v7 = vmax.f32 %v732_v4, 0.0 }
 0x206   : > { %v733_v5 = vpop.f32.mrf.mxu2 }
 0x207   : > { %v734_v6 = vadd.f32 %v1190_v41, %v733_v5 }
 0x209   : > { %v760_v8 = vmax.f32 %v734_v6, 0.0 }
 0x20b   : > { %v771_v9 = vpack.c.bf16 %v760_v8, %v759_v7 }
 0x20d   : > { %871 = vmatmul.bf16.gmra.mxu3 %v771_v9 }
 0x20e   : > { %v736_v10 = vpop.f32.mrf.mxu2 }
 0x20f   : > { %v737_v11 = vadd.f32 %v1190_v41, %v736_v10 }
 0x211   : > { %v761_v14 = vmax.f32 %v737_v11, 0.0 }
 0x216   : > { %v738_v12 = vpop.f32.mrf.mxu2 }
 0x217   : > { %v739_v13 = vadd.f32 %v1190_v41, %v738_v12 }
 0x219   : > { %v762_v15 = vmax.f32 %v739_v13, 0.0 }
 0x21b   : > { %v772_v16 = vpack.c.bf16 %v762_v15, %v761_v14 }
 0x21d   : > { %876 = vmatmul.bf16.gmra.mxu3 %v772_v16 }
 0x21e   : > { %v741_v17 = vpop.f32.mrf.mxu2 }
 0x21f   : > { %v742_v18 = vadd.f32 %v1190_v41, %v741_v17 }
 0x221   : > { %v763_v21 = vmax.f32 %v742_v18, 0.0 }
 0x226   : > { %v743_v19 = vpop.f32.mrf.mxu2 }
 0x227   : > { %v744_v20 = vadd.f32 %v1190_v41, %v743_v19 }
 0x229   : > { %v764_v22 = vmax.f32 %v744_v20, 0.0 }
 0x22b   : > { %v773_v23 = vpack.c.bf16 %v764_v22, %v763_v21 }
 0x22d   : > { %881 = vmatmul.bf16.gmra.mxu3 %v773_v23 }
 0x22e   : > { %v746_v24 = vpop.f32.mrf.mxu2 }
 0x22f   : > { %v747_v25 = vadd.f32 %v1190_v41, %v746_v24 }
 0x231   : > { %v765_v28 = vmax.f32 %v747_v25, 0.0 }
 0x236   : > { %v748_v26 = vpop.f32.mrf.mxu2 }
 0x237   : > { %v749_v27 = vadd.f32 %v1190_v41, %v748_v26 }
 0x239   : > { %v766_v29 = vmax.f32 %v749_v27, 0.0 }
 0x23b   : > { %v774_v30 = vpack.c.bf16 %v766_v29, %v765_v28 }
 0x23d   : > { %886 = vmatmul.bf16.gmra.mxu3 %v774_v30 }
 0x250   : > { %v852_v32 = vpop.f32.mrf.mxu3 }
 0x251   : > { %v853_v33 = vadd.f32 %v1191_v31, %v852_v32 }
 0x253   : > { %892 = vst [vmem:[%s1521_s21] sm:$0xff] %v853_v33 }
 0x258   : > { %v854_v34 = vpop.f32.mrf.mxu3 }
 0x259   : > { %v855_v35 = vadd.f32 %v1191_v31, %v854_v34 }
 0x25b   : > { %893 = vst [vmem:[%s1521_s21 + $0x8] sm:$0xff] %v855_v35 }
 0x260   : > { %v857_v36 = vpop.f32.mrf.mxu3 }
 0x261   : > { %v858_v38 = vadd.f32 %v1191_v31, %v857_v36 }
 0x263   : > { %894 = vst [vmem:[%s1521_s21 + $0x10] sm:$0xff] %v858_v38 }
 0x268   : > { %v859_v40 = vpop.f32.mrf.mxu3 }
 0x269   : > { %v860_v41 = vadd.f32 %v1191_v31, %v859_v40 }
 0x26b   : > { %895 = vst [vmem:[%s1521_s21 + $0x18] sm:$0xff] %v860_v41 }
 0x270   : > { %v862_v42 = vpop.f32.mrf.mxu3 }
 0x271   : > { %v863_v43 = vadd.f32 %v1191_v31, %v862_v42 }
 0x273   : > { %896 = vst [vmem:[%s1521_s21 + $0x20] sm:$0xff] %v863_v43 }
 0x278   : > { %v864_v44 = vpop.f32.mrf.mxu3 }
 0x279   : > { %v865_v45 = vadd.f32 %v1191_v31, %v864_v44 }
 0x27b   : > { %897 = vst [vmem:[%s1521_s21 + $0x28] sm:$0xff] %v865_v45 }
 0x280   : > { %v867_v39 = vpop.f32.mrf.mxu3 }
 0x281   : > { %v868_v37 = vadd.f32 %v1191_v31, %v867_v39 }
 0x283   : > { %898 = vst [vmem:[%s1521_s21 + $0x30] sm:$0xff] %v868_v37 }
 0x288   : > { %v869_v46 = vpop.f32.mrf.mxu3 }
 0x289   : > { %v870_v47 = vadd.f32 %v1191_v31, %v869_v46 }
 0x28b   : > { %899 = vst [vmem:[%s1521_s21 + $0x38] sm:$0xff] %v870_v47 }
 0x290   : > { %v872_v48 = vpop.f32.mrf.mxu3 }
 0x291   : > { %v873_v49 = vadd.f32 %v1191_v31, %v872_v48 }
 0x293   : > { %900 = vst [vmem:[%s1521_s21 + $0x40] sm:$0xff] %v873_v49 }
 0x298   : > { %v874_v50 = vpop.f32.mrf.mxu3 }
 0x299   : > { %v875_v51 = vadd.f32 %v1191_v31, %v874_v50 }
 0x29b   : > { %901 = vst [vmem:[%s1521_s21 + $0x48] sm:$0xff] %v875_v51 }
 0x2a0   : > { %v877_v52 = vpop.f32.mrf.mxu3 }
 0x2a1   : > { %v878_v53 = vadd.f32 %v1191_v31, %v877_v52 }
 0x2a3   : > { %902 = vst [vmem:[%s1521_s21 + $0x50] sm:$0xff] %v878_v53 }
 0x2a8   : > { %v879_v54 = vpop.f32.mrf.mxu3 }
 0x2a9   : > { %v880_v55 = vadd.f32 %v1191_v31, %v879_v54 }
 0x2ab   : > { %903 = vst [vmem:[%s1521_s21 + $0x58] sm:$0xff] %v880_v55 }
 0x2b0   : > { %v882_v56 = vpop.f32.mrf.mxu3 }
 0x2b1   : > { %v883_v57 = vadd.f32 %v1191_v31, %v882_v56 }
 0x2b3   : > { %904 = vst [vmem:[%s1521_s21 + $0x60] sm:$0xff] %v883_v57 }
 0x2b8   : > { %v884_v58 = vpop.f32.mrf.mxu3 }
 0x2b9   : > { %v885_v59 = vadd.f32 %v1191_v31, %v884_v58 }
 0x2bb   : > { %905 = vst [vmem:[%s1521_s21 + $0x68] sm:$0xff] %v885_v59 }
 0x2c0   : > { %v887_v60 = vpop.f32.mrf.mxu3 }
 0x2c1   : > { %v888_v61 = vadd.f32 %v1191_v31, %v887_v60 }
 0x2c3   : > { %906 = vst [vmem:[%s1521_s21 + $0x70] sm:$0xff] %v888_v61 }
 0x2c8   : > { %v889_v62 = vpop.f32.mrf.mxu3 }
 0x2c9   : > { %v890_v63 = vadd.f32 %v1191_v31, %v889_v62 }
 0x2cb   : > { %907 = vst [vmem:[%s1521_s21 + $0x78] sm:$0xff] %v890_v63 }
 0x2cc   : > { %1219 = shalt.err (!%p1216_p3)
}
 0x2cd   : > { %s1256_s16 = smov 128   ;;  %s1257_s21 = smov 8  }
 0x2ce   : > { %1147 = dma.vmem_to_hbm [thread:$0]  (%p1346_p5), %s922_s26, 2048, %s924_s27, %s909_s28, %s1256_s16, %s1256_s16, %s1257_s21  }
 0x2cf PF: > { %p1153_p4 = scmp.ge.s32.totalorder %s1254_s12, 2  ;;  %s938_s25 = sand.u32 1, %s1242_s30  }
 0x2d0   : > { %s939_s14 = scalar_lea.sflag [#allocation3], %s938_s25 }
 0x2d1   : > { %p1150_p7 = pnand %p1153_p4, %p1350_p6 }
 0x2d3   : > { %p1151_p8 = pneg %p1150_p7 }
 0x2d5   : > { %1237 = dma.done.wait (%p1151_p8), %s939_s14, 2048  }
 0x2d6   : > { %1239 = vsyncadd (%p1151_p8), %s939_s14, 4294965248  ;;  %p19_p9 = scmp.ge.s32.totalorder %s1333_s15, 6   ;;  %s1585_s30 = smov %s1246_s10 }
 0x2d7   : > { %s1586_s10 = smov %s1250_s11  ;;  %s1587_s11 = smov %s1344_s18 }
 0x2d8   : > { %s1588_s12 = smov %s1333_s15  ;;  %21 = sbr.rel (!%p19_p9) target bundleno = 3 (0x3), region = 91 }
 0x2dd   :  { %945 = vsyncpa [#allocation3], 1 }
 0x2de   :  { %947 = vsyncpa [#allocation3 + $0x1], 1 }

</bundles_post_ra>
